<compile_context>
chip_gen: v5e
topology: v5e:2x2
jax: 0.10.0
libtpu: 0.0.40
codegen_flags: <defaults>
</compile_context>

<pallas_src>
import functools

import jax
import jax.numpy as jnp
from jax import lax
from jax.experimental import pallas as pl
from jax.experimental.pallas import tpu as pltpu

FEAT_DIM = 512   # representation width implied by nn.Linear(512, n_classes)


def _round_up(x, m):
    return ((x + m - 1) // m) * m


def _vmem_budget_bytes():
    """Scoped-VMEM budget derived from the actual chip.

    128 MiB parts (v5e/v6e) can afford a larger scoped budget (~0.7*cap);
    64 MiB parts (v7x per-core) stay at half."""
    try:
        cap = int(pltpu.get_tpu_info().vmem_capacity_bytes)
    except Exception:
        cap = 64 * 1024 * 1024
    frac = 0.7 if cap >= 96 * 1024 * 1024 else 0.5
    return max(int(cap * frac), 16 * 1024 * 1024)


def _choose_tiles(B, C, HW, itemsize, budget, out_pad, emit_repr):
    """Pick (TB, TS) so 2 streamed x buffers + resident weights + outputs +
    accumulator fit in ~85% of the scoped-VMEM budget."""
    C_acc = _round_up(C, 128)          # accumulator lane width / matmul K
    C_sub = _round_up(C, 8)            # sublane padding of the streamed x tile

    # Batch tile: >= 2 tiles whenever B allows it (v7x has 2 TensorCores and
    # only the "parallel" batch axis is megacore-sharded).  For small B the
    # tile equals the full batch so the output layout rule (dim multiple of 8
    # OR equal to the full dim) is satisfied without padding x.
    if B < 16:
        TB = B
    else:
        TB = min(128, _round_up((B + 1) // 2, 8))

    def fixed_bytes(tb):
        tb_acc = max(_round_up(tb, 8), 8)
        # conservative: count 2 copies of the weights in case the
        # single-buffer request (pl.Buffered(1)) is not honored.
        wts = 2 * 4 * (C_acc * FEAT_DIM + FEAT_DIM + FEAT_DIM * out_pad + out_pad)
        outs = 2 * 4 * tb * (out_pad + (FEAT_DIM if emit_repr else 0))
        acc = 4 * tb_acc * C_acc
        return wts + outs + acc

    usable = int(budget * 0.85)
    while True:
        avail = usable - fixed_bytes(TB)
        per_ts = 2 * TB * C_sub * itemsize           # double-buffered x tile
        ts_fit = max(avail // per_ts, 0)
        if ts_fit >= 128 or TB <= 8 or TB == B:
            break
        TB = max(8, _round_up(TB // 2, 8))           # back off the batch tile

    if HW <= ts_fit or HW <= 128:
        TS = HW                                      # whole spatial extent
    else:
        TS = max((ts_fit // 128) * 128, 128)
    return TB, TS


def _finetune_kernel(x_ref, w_feat_ref, b_feat_ref, w_out_ref, b_out_ref,
                     logits_ref, *rest, inv_hw, hw_rem, emit_repr):
    # rest = (repr_ref, acc_ref) if emit_repr else (acc_ref,)
    if emit_repr:
        repr_ref, acc_ref = rest
    else:
        (acc_ref,) = rest

    tb, c, ts = x_ref.shape
    s = pl.program_id(1)
    ns = pl.num_programs(1)

    @pl.when(s == 0)
    def _():
        # Also zeroes the padded lanes/rows of the accumulator, so no padded
        # channels ever need to be streamed from HBM.
        acc_ref[...] = jnp.zeros_like(acc_ref)

    x = x_ref[...].astype(jnp.float32)               # (TB, C, TS)
    if hw_rem:
        # Last spatial tile is partial: zero the out-of-bounds lanes (their
        # HBM-side contents are unspecified and may be NaN/Inf).
        limit = jnp.where(s == ns - 1, hw_rem, ts)
        lane = lax.broadcasted_iota(jnp.int32, x.shape, 2)
        x = jnp.where(lane < limit, x, 0.0)

    # TODO(synk): if v7x bundle dumps show the per-step cross-lane reduce
    # (XLU) binding, keep per-lane partial sums and do one reduce at finalize
    # (or contract against a ones vector on the idle MXU).
    acc_ref[0:tb, 0:c] += jnp.sum(x, axis=-1)

    @pl.when(s == ns - 1)
    def _():
        # Finalize: scale by 1/(H*W), then the two tiny fused matmuls.
        pooled = acc_ref[...] * inv_hw                           # (TBa, C_acc)
        feat = jnp.dot(pooled, w_feat_ref[...],
                       preferred_element_type=jnp.float32)        # (TBa, 512)
        feat = jnp.maximum(feat + b_feat_ref[...], 0.0)
        if emit_repr:
            repr_ref[...] = feat[0:tb].astype(repr_ref.dtype)
        logits = jnp.dot(feat, w_out_ref[...],
                         preferred_element_type=jnp.float32)      # (TBa, OUTp)
        logits_ref[...] = (logits[0:tb] + b_out_ref[...]).astype(logits_ref.dtype)


def net_wrapper_finetune_forward(x, params, return_projection=False,
                                 return_representation=False):
    """Pallas implementation of NetWrapperFineTune.forward (default path)."""
    # TODO(synk): projector branch (MLP / SimSiamMLP) not implemented.
    assert not return_projection, "projector branch not implemented"

    B, C, H, W = x.shape
    HW = H * W
    n_classes = params["w_out"].shape[1]
    out_pad = _round_up(max(n_classes, 1), 128)      # lane-dense logits
    itemsize = jnp.dtype(x.dtype).itemsize

    budget = _vmem_budget_bytes()
    TB, TS = _choose_tiles(B, C, HW, itemsize, budget, out_pad,
                           return_representation)
    C_acc = _round_up(C, 128)
    TB_acc = max(_round_up(TB, 8), 8)
    hw_rem = HW % TS

    # Activations: reshape only (contiguous dim merge; NO HBM copy / pad).
    x3 = x.reshape(B, C, HW)

    # Cheap weight/bias pads only (padded rows/cols are zero => sum-neutral;
    # padded logit columns are sliced off after the call).
    w_feat = jnp.pad(params["w_feat"].astype(jnp.float32),
                     ((0, C_acc - C), (0, 0)))                    # (C_acc, 512)
    b_feat = params["b_feat"].astype(jnp.float32).reshape(1, FEAT_DIM)
    w_out = jnp.pad(params["w_out"].astype(jnp.float32),
                    ((0, 0), (0, out_pad - n_classes)))           # (512, OUTp)
    b_out = jnp.pad(params["b_out"].astype(jnp.float32).reshape(1, n_classes),
                    ((0, 0), (0, out_pad - n_classes)))           # (1, OUTp)

    grid = (pl.cdiv(B, TB), pl.cdiv(HW, TS))

    out_shape = [jax.ShapeDtypeStruct((B, out_pad), jnp.float32)]
    out_specs = [pl.BlockSpec((TB, out_pad), lambda i, s: (i, 0))]
    if return_representation:
        out_shape.append(jax.ShapeDtypeStruct((B, FEAT_DIM), jnp.float32))
        out_specs.append(pl.BlockSpec((TB, FEAT_DIM), lambda i, s: (i, 0)))

    kernel = functools.partial(_finetune_kernel, inv_hw=float(1.0 / HW),
                               hw_rem=int(hw_rem),
                               emit_repr=return_representation)

    cost = pl.CostEstimate(
        flops=int(B * C * HW + 2 * B * C_acc * FEAT_DIM
                  + 2 * B * FEAT_DIM * out_pad),
        transcendentals=0,
        bytes_accessed=int(B * C * HW * itemsize
                           + 4 * (C_acc * FEAT_DIM + FEAT_DIM
                                  + FEAT_DIM * out_pad + out_pad)
                           + 4 * B * (out_pad
                                      + (FEAT_DIM if return_representation else 0))),
    )

    def run(single_buffer_weights):
        # Constant-index resident operands do not need double-buffering.
        wkw = (dict(pipeline_mode=pl.Buffered(1))
               if single_buffer_weights else {})
        in_specs = [
            # streamed activations: (TB, C, TS) per grid step (C un-padded)
            pl.BlockSpec((TB, C, TS), lambda i, s: (i, 0, s)),
            # resident weights/biases: same block every step -> DMA'd once
            pl.BlockSpec((C_acc, FEAT_DIM), lambda i, s: (0, 0), **wkw),
            pl.BlockSpec((1, FEAT_DIM), lambda i, s: (0, 0), **wkw),
            pl.BlockSpec((FEAT_DIM, out_pad), lambda i, s: (0, 0), **wkw),
            pl.BlockSpec((1, out_pad), lambda i, s: (0, 0), **wkw),
        ]
        return pl.pallas_call(
            kernel,
            out_shape=tuple(out_shape),
            grid_spec=pltpu.PrefetchScalarGridSpec(
                num_scalar_prefetch=0,
                grid=grid,
                in_specs=in_specs,
                out_specs=tuple(out_specs),
                scratch_shapes=[pltpu.VMEM((TB_acc, C_acc), jnp.float32)],
            ),
            compiler_params=pltpu.CompilerParams(
                dimension_semantics=("parallel", "arbitrary"),
                vmem_limit_bytes=int(budget),
            ),
            cost_estimate=cost,
        )(x3, w_feat, b_feat, w_out, b_out)

    try:
        outs = run(True)
    except Exception:
        # pl.Buffered(1) (single-buffered resident weights) is not supported
        # on every jax version; fall back to default (double) buffering.
        outs = run(False)

    if return_representation:
        logits_p, repr_p = outs
        return logits_p[:, :n_classes], repr_p
    (logits_p,) = outs
    return logits_p[:, :n_classes]


def _reference_forward(x, params):
    B, C, H, W = x.shape
    pooled = x.reshape(B, C, H * W).mean(-1)
    feat = jnp.maximum(pooled @ params["w_feat"]
                       + params["b_feat"].reshape(1, -1), 0.0)
    logits = feat @ params["w_out"] + params["b_out"].reshape(1, -1)
    return logits, feat


def _init_params(key, c_in, n_classes):
    k1, k2, k3, k4 = jax.random.split(key, 4)
    return {
        "w_feat": jax.random.normal(k1, (c_in, FEAT_DIM), jnp.float32) * 0.05,
        "b_feat": jax.random.normal(k2, (1, FEAT_DIM), jnp.float32) * 0.01,
        "w_out":  jax.random.normal(k3, (FEAT_DIM, n_classes), jnp.float32) * 0.05,
        "b_out":  jax.random.normal(k4, (1, n_classes), jnp.float32) * 0.01,
    }


if __name__ == "__main__":
    key = jax.random.PRNGKey(0)
    kx, kp = jax.random.split(key)

    B, C, H, W = 2, 4, 16, 16
    N_CLASSES = 1  # NetWrapperFineTune default n_classes=1
    x = jax.random.normal(kx, (B, C, H, W), jnp.float32)
    params = _init_params(kp, C, N_CLASSES)

    ref_logits, ref_repr = _reference_forward(x, params)

    # Verification path (also returns the hook representation).
    logits, representation = net_wrapper_finetune_forward(
        x, params, return_representation=True)
    logits = jax.block_until_ready(logits)
    representation = jax.block_until_ready(representation)

    assert logits.shape == (B, N_CLASSES)
    assert representation.shape == (B, FEAT_DIM)
    assert jnp.allclose(logits, ref_logits, atol=1e-4, rtol=1e-4)
    assert jnp.allclose(representation, ref_repr, atol=1e-4, rtol=1e-4)

    # Default module path: forward(return_projection=False) -> logits only
    # (skips the representation HBM writeback entirely).
    logits_only = jax.block_until_ready(net_wrapper_finetune_forward(x, params))
    assert logits_only.shape == (B, N_CLASSES)
    assert jnp.allclose(logits_only, ref_logits, atol=1e-4, rtol=1e-4)

    print("KERNEL_OK")
</pallas_src>

<mosaic_0001>
module attributes {stable_mosaic.version = 11 : i64} {
  func.func @_finetune_kernel(%arg0: i32, %arg1: i32, %arg2: memref<2x4x256xf32, #tpu.memory_space<vmem>>, %arg3: memref<128x512xf32, #tpu.memory_space<vmem>>, %arg4: memref<1x512xf32, #tpu.memory_space<vmem>>, %arg5: memref<512x128xf32, #tpu.memory_space<vmem>>, %arg6: memref<1x128xf32, #tpu.memory_space<vmem>>, %arg7: memref<2x128xf32, #tpu.memory_space<vmem>>, %arg8: memref<2x512xf32, #tpu.memory_space<vmem>>, %arg9: memref<8x128xf32, #tpu.memory_space<vmem>>) attributes {dimension_semantics = [#tpu.dimension_semantics<parallel>, #tpu.dimension_semantics<arbitrary>], iteration_bounds = array<i64: 1, 1>, scalar_prefetch = 0 : i64, scratch_operands = 1 : i64, tpu.core_type = #tpu.core_type<tc>, window_params = [{transform_indices = @transform_0, window_bounds = array<i64: 2, 4, 256>}, {pipeline_mode = #tpu.pipeline_mode<synchronous>, transform_indices = @transform_1, window_bounds = array<i64: 128, 512>}, {pipeline_mode = #tpu.pipeline_mode<synchronous>, transform_indices = @transform_2, window_bounds = array<i64: 1, 512>}, {pipeline_mode = #tpu.pipeline_mode<synchronous>, transform_indices = @transform_3, window_bounds = array<i64: 512, 128>}, {pipeline_mode = #tpu.pipeline_mode<synchronous>, transform_indices = @transform_4, window_bounds = array<i64: 1, 128>}, {transform_indices = @transform_5, window_bounds = array<i64: 2, 128>}, {transform_indices = @transform_6, window_bounds = array<i64: 2, 512>}]} {
    %c0_i32 = arith.constant 0 : i32
    %0 = arith.cmpi eq, %arg1, %c0_i32 : i32
    %1 = arith.extui %0 : i1 to i32
    %c0_i32_0 = arith.constant 0 : i32
    %2 = arith.cmpi ne, %1, %c0_i32_0 : i32
    scf.if %2 {
      %cst_9 = arith.constant 0.000000e+00 : f32
      %11 = vector.broadcast %cst_9 : f32 to vector<8x128xf32>
      %c0_10 = arith.constant 0 : index
      %c0_11 = arith.constant 0 : index
      %12 = vector.load %arg9[%c0_10, %c0_11] : memref<8x128xf32, #tpu.memory_space<vmem>>, vector<8x128xf32>
      tpu.vector_store %arg9[%c0_10, %c0_11], %11 {strides = array<i32>} : memref<8x128xf32, #tpu.memory_space<vmem>>, vector<8x128xf32>,
    } else {
    }
    %c0 = arith.constant 0 : index
    %c0_1 = arith.constant 0 : index
    %c0_2 = arith.constant 0 : index
    %3 = vector.load %arg2[%c0, %c0_1, %c0_2] : memref<2x4x256xf32, #tpu.memory_space<vmem>>, vector<2x4x256xf32>
    %c0_3 = arith.constant 0 : index
    %c0_4 = arith.constant 0 : index
    %4 = vector.load %arg9[%c0_3, %c0_4] : memref<8x128xf32, #tpu.memory_space<vmem>>, vector<2x4xf32>
    %cst = arith.constant dense<0.000000e+00> : vector<2x4xf32>
    %5 = vector.multi_reduction <add>, %3, %cst [2] : vector<2x4x256xf32> to vector<2x4xf32>
    %6 = arith.addf %4, %5 : vector<2x4xf32>
    %c0_5 = arith.constant 0 : index
    %c0_6 = arith.constant 0 : index
    %7 = vector.load %arg9[%c0_5, %c0_6] : memref<8x128xf32, #tpu.memory_space<vmem>>, vector<2x4xf32>
    tpu.vector_store %arg9[%c0_5, %c0_6], %6 {strides = array<i32>} : memref<8x128xf32, #tpu.memory_space<vmem>>, vector<2x4xf32>,
    %c0_i32_7 = arith.constant 0 : i32
    %8 = arith.cmpi eq, %arg1, %c0_i32_7 : i32
    %9 = arith.extui %8 : i1 to i32
    %c0_i32_8 = arith.constant 0 : i32
    %10 = arith.cmpi ne, %9, %c0_i32_8 : i32
    scf.if %10 {
      %c0_9 = arith.constant 0 : index
      %c0_10 = arith.constant 0 : index
      %11 = vector.load %arg9[%c0_9, %c0_10] : memref<8x128xf32, #tpu.memory_space<vmem>>, vector<8x128xf32>
      %cst_11 = arith.constant 3.906250e-03 : f32
      %12 = vector.broadcast %cst_11 : f32 to vector<8x128xf32>
      %13 = arith.mulf %11, %12 : vector<8x128xf32>
      %c0_12 = arith.constant 0 : index
      %c0_13 = arith.constant 0 : index
      %14 = vector.load %arg3[%c0_12, %c0_13] : memref<128x512xf32, #tpu.memory_space<vmem>>, vector<128x512xf32>
      %cst_14 = arith.constant dense<0.000000e+00> : vector<8x512xf32>
      %15 = tpu.matmul %13, %14, %cst_14 {dimension_numbers = #tpu.dot_dimension_numbers<[1], [0], [0], [1], [0, 0, 1, 1], [], []>} : vector<8x128xf32>, vector<128x512xf32>, vector<8x512xf32> -> vector<8x512xf32>
      %c0_15 = arith.constant 0 : index
      %c0_16 = arith.constant 0 : index
      %16 = vector.load %arg4[%c0_15, %c0_16] : memref<1x512xf32, #tpu.memory_space<vmem>>, vector<1x512xf32>
      %17 = vector.broadcast %16 : vector<1x512xf32> to vector<8x512xf32>
      %18 = arith.addf %15, %17 : vector<8x512xf32>
      %cst_17 = arith.constant 0.000000e+00 : f32
      %19 = vector.broadcast %cst_17 : f32 to vector<8x512xf32>
      %20 = arith.maximumf %18, %19 : vector<8x512xf32>
      %21 = vector.extract_strided_slice %20 {offsets = [0, 0], sizes = [2, 512], strides = [1, 1]} : vector<8x512xf32> to vector<2x512xf32>
      %c0_18 = arith.constant 0 : index
      %c0_19 = arith.constant 0 : index
      %22 = vector.load %arg8[%c0_18, %c0_19] : memref<2x512xf32, #tpu.memory_space<vmem>>, vector<2x512xf32>
      tpu.vector_store %arg8[%c0_18, %c0_19], %21 {strides = array<i32>} : memref<2x512xf32, #tpu.memory_space<vmem>>, vector<2x512xf32>,
      %c0_20 = arith.constant 0 : index
      %c0_21 = arith.constant 0 : index
      %23 = vector.load %arg5[%c0_20, %c0_21] : memref<512x128xf32, #tpu.memory_space<vmem>>, vector<512x128xf32>
      %cst_22 = arith.constant dense<0.000000e+00> : vector<8x128xf32>
      %24 = tpu.matmul %20, %23, %cst_22 {dimension_numbers = #tpu.dot_dimension_numbers<[1], [0], [0], [1], [0, 0, 1, 1], [], []>} : vector<8x512xf32>, vector<512x128xf32>, vector<8x128xf32> -> vector<8x128xf32>
      %25 = vector.extract_strided_slice %24 {offsets = [0, 0], sizes = [2, 128], strides = [1, 1]} : vector<8x128xf32> to vector<2x128xf32>
      %c0_23 = arith.constant 0 : index
      %c0_24 = arith.constant 0 : index
      %26 = vector.load %arg6[%c0_23, %c0_24] : memref<1x128xf32, #tpu.memory_space<vmem>>, vector<1x128xf32>
      %27 = vector.broadcast %26 : vector<1x128xf32> to vector<2x128xf32>
      %28 = arith.addf %25, %27 : vector<2x128xf32>
      %c0_25 = arith.constant 0 : index
      %c0_26 = arith.constant 0 : index
      %29 = vector.load %arg7[%c0_25, %c0_26] : memref<2x128xf32, #tpu.memory_space<vmem>>, vector<2x128xf32>
      tpu.vector_store %arg7[%c0_25, %c0_26], %28 {strides = array<i32>} : memref<2x128xf32, #tpu.memory_space<vmem>>, vector<2x128xf32>,
    } else {
    }
    return
  }
  func.func @transform_0(%arg0: i32, %arg1: i32) -> (i32, i32, i32) {
    %c0_i32 = arith.constant 0 : i32
    %c0_i32_0 = arith.constant 0 : i32
    return %arg0, %c0_i32, %arg1 : i32, i32, i32
  }
  func.func @transform_1(%arg0: i32, %arg1: i32) -> (i32, i32) {
    %c0_i32 = arith.constant 0 : i32
    %c0_i32_0 = arith.constant 0 : i32
    %c0_i32_1 = arith.constant 0 : i32
    return %c0_i32, %c0_i32_0 : i32, i32
  }
  func.func @transform_2(%arg0: i32, %arg1: i32) -> (i32, i32) {
    %c0_i32 = arith.constant 0 : i32
    %c0_i32_0 = arith.constant 0 : i32
    %c0_i32_1 = arith.constant 0 : i32
    return %c0_i32, %c0_i32_0 : i32, i32
  }
  func.func @transform_3(%arg0: i32, %arg1: i32) -> (i32, i32) {
    %c0_i32 = arith.constant 0 : i32
    %c0_i32_0 = arith.constant 0 : i32
    %c0_i32_1 = arith.constant 0 : i32
    return %c0_i32, %c0_i32_0 : i32, i32
  }
  func.func @transform_4(%arg0: i32, %arg1: i32) -> (i32, i32) {
    %c0_i32 = arith.constant 0 : i32
    %c0_i32_0 = arith.constant 0 : i32
    %c0_i32_1 = arith.constant 0 : i32
    return %c0_i32, %c0_i32_0 : i32, i32
  }
  func.func @transform_5(%arg0: i32, %arg1: i32) -> (i32, i32) {
    %c0_i32 = arith.constant 0 : i32
    %c0_i32_0 = arith.constant 0 : i32
    return %arg0, %c0_i32 : i32, i32
  }
  func.func @transform_6(%arg0: i32, %arg1: i32) -> (i32, i32) {
    %c0_i32 = arith.constant 0 : i32
    %c0_i32_0 = arith.constant 0 : i32
    return %arg0, %c0_i32 : i32, i32
  }
}

module attributes {stable_mosaic.version = 11 : i64} {
  func.func @_finetune_kernel(%arg0: i32, %arg1: i32, %arg2: memref<2x4x256xf32, #tpu.memory_space<vmem>>, %arg3: memref<128x512xf32, #tpu.memory_space<vmem>>, %arg4: memref<1x512xf32, #tpu.memory_space<vmem>>, %arg5: memref<512x128xf32, #tpu.memory_space<vmem>>, %arg6: memref<1x128xf32, #tpu.memory_space<vmem>>, %arg7: memref<2x128xf32, #tpu.memory_space<vmem>>, %arg8: memref<2x512xf32, #tpu.memory_space<vmem>>, %arg9: memref<8x128xf32, #tpu.memory_space<vmem>>) attributes {dimension_semantics = [#tpu.dimension_semantics<parallel>, #tpu.dimension_semantics<arbitrary>], iteration_bounds = array<i64: 1, 1>, scalar_prefetch = 0 : i64, scratch_operands = 1 : i64, tpu.core_type = #tpu.core_type<tc>, window_params = [{transform_indices = @transform_0, window_bounds = array<i64: 2, 4, 256>}, {pipeline_mode = #tpu.pipeline_mode<synchronous>, transform_indices = @transform_1, window_bounds = array<i64: 128, 512>}, {pipeline_mode = #tpu.pipeline_mode<synchronous>, transform_indices = @transform_2, window_bounds = array<i64: 1, 512>}, {pipeline_mode = #tpu.pipeline_mode<synchronous>, transform_indices = @transform_3, window_bounds = array<i64: 512, 128>}, {pipeline_mode = #tpu.pipeline_mode<synchronous>, transform_indices = @transform_4, window_bounds = array<i64: 1, 128>}, {transform_indices = @transform_5, window_bounds = array<i64: 2, 128>}, {transform_indices = @transform_6, window_bounds = array<i64: 2, 512>}]} {
    %c0_i32 = arith.constant 0 : i32
    %0 = arith.cmpi eq, %arg1, %c0_i32 : i32
    %1 = arith.extui %0 : i1 to i32
    %c0_i32_0 = arith.constant 0 : i32
    %2 = arith.cmpi ne, %1, %c0_i32_0 : i32
    scf.if %2 {
      %cst_9 = arith.constant 0.000000e+00 : f32
      %11 = vector.broadcast %cst_9 : f32 to vector<8x128xf32>
      %c0_10 = arith.constant 0 : index
      %c0_11 = arith.constant 0 : index
      %12 = vector.load %arg9[%c0_10, %c0_11] : memref<8x128xf32, #tpu.memory_space<vmem>>, vector<8x128xf32>
      tpu.vector_store %arg9[%c0_10, %c0_11], %11 {strides = array<i32>} : memref<8x128xf32, #tpu.memory_space<vmem>>, vector<8x128xf32>,
    } else {
    }
    %c0 = arith.constant 0 : index
    %c0_1 = arith.constant 0 : index
    %c0_2 = arith.constant 0 : index
    %3 = vector.load %arg2[%c0, %c0_1, %c0_2] : memref<2x4x256xf32, #tpu.memory_space<vmem>>, vector<2x4x256xf32>
    %c0_3 = arith.constant 0 : index
    %c0_4 = arith.constant 0 : index
    %4 = vector.load %arg9[%c0_3, %c0_4] : memref<8x128xf32, #tpu.memory_space<vmem>>, vector<2x4xf32>
    %cst = arith.constant dense<0.000000e+00> : vector<2x4xf32>
    %5 = vector.multi_reduction <add>, %3, %cst [2] : vector<2x4x256xf32> to vector<2x4xf32>
    %6 = arith.addf %4, %5 : vector<2x4xf32>
    %c0_5 = arith.constant 0 : index
    %c0_6 = arith.constant 0 : index
    %7 = vector.load %arg9[%c0_5, %c0_6] : memref<8x128xf32, #tpu.memory_space<vmem>>, vector<2x4xf32>
    tpu.vector_store %arg9[%c0_5, %c0_6], %6 {strides = array<i32>} : memref<8x128xf32, #tpu.memory_space<vmem>>, vector<2x4xf32>,
    %c0_i32_7 = arith.constant 0 : i32
    %8 = arith.cmpi eq, %arg1, %c0_i32_7 : i32
    %9 = arith.extui %8 : i1 to i32
    %c0_i32_8 = arith.constant 0 : i32
    %10 = arith.cmpi ne, %9, %c0_i32_8 : i32
    scf.if %10 {
      %c0_9 = arith.constant 0 : index
      %c0_10 = arith.constant 0 : index
      %11 = vector.load %arg9[%c0_9, %c0_10] : memref<8x128xf32, #tpu.memory_space<vmem>>, vector<8x128xf32>
      %cst_11 = arith.constant 3.906250e-03 : f32
      %12 = vector.broadcast %cst_11 : f32 to vector<8x128xf32>
      %13 = arith.mulf %11, %12 : vector<8x128xf32>
      %c0_12 = arith.constant 0 : index
      %c0_13 = arith.constant 0 : index
      %14 = vector.load %arg3[%c0_12, %c0_13] : memref<128x512xf32, #tpu.memory_space<vmem>>, vector<128x512xf32>
      %cst_14 = arith.constant dense<0.000000e+00> : vector<8x512xf32>
      %15 = tpu.matmul %13, %14, %cst_14 {dimension_numbers = #tpu.dot_dimension_numbers<[1], [0], [0], [1], [0, 0, 1, 1], [], []>} : vector<8x128xf32>, vector<128x512xf32>, vector<8x512xf32> -> vector<8x512xf32>
      %c0_15 = arith.constant 0 : index
      %c0_16 = arith.constant 0 : index
      %16 = vector.load %arg4[%c0_15, %c0_16] : memref<1x512xf32, #tpu.memory_space<vmem>>, vector<1x512xf32>
      %17 = vector.broadcast %16 : vector<1x512xf32> to vector<8x512xf32>
      %18 = arith.addf %15, %17 : vector<8x512xf32>
      %cst_17 = arith.constant 0.000000e+00 : f32
      %19 = vector.broadcast %cst_17 : f32 to vector<8x512xf32>
      %20 = arith.maximumf %18, %19 : vector<8x512xf32>
      %21 = vector.extract_strided_slice %20 {offsets = [0, 0], sizes = [2, 512], strides = [1, 1]} : vector<8x512xf32> to vector<2x512xf32>
      %c0_18 = arith.constant 0 : index
      %c0_19 = arith.constant 0 : index
      %22 = vector.load %arg8[%c0_18, %c0_19] : memref<2x512xf32, #tpu.memory_space<vmem>>, vector<2x512xf32>
      tpu.vector_store %arg8[%c0_18, %c0_19], %21 {strides = array<i32>} : memref<2x512xf32, #tpu.memory_space<vmem>>, vector<2x512xf32>,
      %c0_20 = arith.constant 0 : index
      %c0_21 = arith.constant 0 : index
      %23 = vector.load %arg5[%c0_20, %c0_21] : memref<512x128xf32, #tpu.memory_space<vmem>>, vector<512x128xf32>
      %cst_22 = arith.constant dense<0.000000e+00> : vector<8x128xf32>
      %24 = tpu.matmul %20, %23, %cst_22 {dimension_numbers = #tpu.dot_dimension_numbers<[1], [0], [0], [1], [0, 0, 1, 1], [], []>} : vector<8x512xf32>, vector<512x128xf32>, vector<8x128xf32> -> vector<8x128xf32>
      %25 = vector.extract_strided_slice %24 {offsets = [0, 0], sizes = [2, 128], strides = [1, 1]} : vector<8x128xf32> to vector<2x128xf32>
      %c0_23 = arith.constant 0 : index
      %c0_24 = arith.constant 0 : index
      %26 = vector.load %arg6[%c0_23, %c0_24] : memref<1x128xf32, #tpu.memory_space<vmem>>, vector<1x128xf32>
      %27 = vector.broadcast %26 : vector<1x128xf32> to vector<2x128xf32>
      %28 = arith.addf %25, %27 : vector<2x128xf32>
      %c0_25 = arith.constant 0 : index
      %c0_26 = arith.constant 0 : index
      %29 = vector.load %arg7[%c0_25, %c0_26] : memref<2x128xf32, #tpu.memory_space<vmem>>, vector<2x128xf32>
      tpu.vector_store %arg7[%c0_25, %c0_26], %28 {strides = array<i32>} : memref<2x128xf32, #tpu.memory_space<vmem>>, vector<2x128xf32>,
    } else {
    }
    return
  }
  func.func @transform_0(%arg0: i32, %arg1: i32) -> (i32, i32, i32) {
    %c0_i32 = arith.constant 0 : i32
    %c0_i32_0 = arith.constant 0 : i32
    return %arg0, %c0_i32, %arg1 : i32, i32, i32
  }
  func.func @transform_1(%arg0: i32, %arg1: i32) -> (i32, i32) {
    %c0_i32 = arith.constant 0 : i32
    %c0_i32_0 = arith.constant 0 : i32
    %c0_i32_1 = arith.constant 0 : i32
    return %c0_i32, %c0_i32_0 : i32, i32
  }
  func.func @transform_2(%arg0: i32, %arg1: i32) -> (i32, i32) {
    %c0_i32 = arith.constant 0 : i32
    %c0_i32_0 = arith.constant 0 : i32
    %c0_i32_1 = arith.constant 0 : i32
    return %c0_i32, %c0_i32_0 : i32, i32
  }
  func.func @transform_3(%arg0: i32, %arg1: i32) -> (i32, i32) {
    %c0_i32 = arith.constant 0 : i32
    %c0_i32_0 = arith.constant 0 : i32
    %c0_i32_1 = arith.constant 0 : i32
    return %c0_i32, %c0_i32_0 : i32, i32
  }
  func.func @transform_4(%arg0: i32, %arg1: i32) -> (i32, i32) {
    %c0_i32 = arith.constant 0 : i32
    %c0_i32_0 = arith.constant 0 : i32
    %c0_i32_1 = arith.constant 0 : i32
    return %c0_i32, %c0_i32_0 : i32, i32
  }
  func.func @transform_5(%arg0: i32, %arg1: i32) -> (i32, i32) {
    %c0_i32 = arith.constant 0 : i32
    %c0_i32_0 = arith.constant 0 : i32
    return %arg0, %c0_i32 : i32, i32
  }
  func.func @transform_6(%arg0: i32, %arg1: i32) -> (i32, i32) {
    %c0_i32 = arith.constant 0 : i32
    %c0_i32_0 = arith.constant 0 : i32
    return %arg0, %c0_i32 : i32, i32
  }
}

</mosaic_0001>

<bundles_post_ra>
// kernel: tpu_custom_call.1
= control target key start
LH: loop header
LB: loop body
LE: loop exit
PB: predicated region body
PF: predicated region fallthrough
CT: control target
= control target key end

     0   :  { %12 = vsyncpa [#allocation4], 0  ;;  %s730_s0 = inlined_call_operand.hbm [shape: f32[2,4,256], index: 0, kind: input, shape index: {}]   ;;  %s731_s1 = inlined_call_operand.hbm [shape: f32[128,512], index: 1, kind: input, shape index: {}]   ;;  %s732_s2 = inlined_call_operand.hbm [shape: f32[1,512], index: 2, kind: input, shape index: {}]   ;;  %s733_s3 = inlined_call_operand.hbm [shape: f32[512,128], index: 3, kind: input, shape index: {}]   ;;  %s734_s4 = inlined_call_operand.vmem [shape: f32[1,128], index: 4, kind: input, shape index: {}]   ;;  %s735_s5 = inlined_call_operand.hbm [shape: f32[2,128], index: 5, kind: output, shape index: {0}]   ;;  %s736_s6 = inlined_call_operand.hbm [shape: f32[2,512], index: 6, kind: output, shape index: {1}]  }
   0x1   :  { %13 = vsyncpa [#allocation7], 0 }
   0x2   :  { %14 = vsyncpa [#allocation10], 0 }
   0x3   :  { %15 = vsyncpa [#allocation5], 0  ;;  %s34_s23 = sshll.u32 %s731_s1, 4  ;;  %s35_s23 = int_to_ptr.hbm [resolvable:$true] %s34_s23 }
   0x4   :  { %16 = vsyncpa [#allocation13], 0  ;;  %s657_s24 = smov [#allocation6]   ;;  %s21_s28 = sshll.u32 %s730_s0, 4  ;;  %s22_s28 = int_to_ptr.hbm [resolvable:$true] %s21_s28 }
   0x5   :  { %s36_s25 = sshll.u32 %s657_s24, 4  ;;  %s658_s29 = smov 512   ;;  %s37_s25 = int_to_ptr.vmem [resolvable:$true] %s36_s25 }
   0x6   :  { %s659_s30 = smov 32   ;;  %s660_s7 = smov [#allocation3]  }
   0x7   :  { %42 = dma.hbm_to_vmem [thread:$0]  %s35_s23, 8192, %s37_s25, [#allocation7], %s658_s29, %s658_s29, %s659_s30  }
   0x8   :  { %s23_s8 = sshll.u32 %s660_s7, 4  ;;  %s661_s9 = smov 128   ;;  %s24_s8 = int_to_ptr.vmem [resolvable:$true] %s23_s8 }
   0x9   :  { %s662_s10 = smov 8   ;;  %s48_s12 = sshll.u32 %s732_s2, 4  ;;  %s49_s12 = int_to_ptr.hbm [resolvable:$true] %s48_s12 }
   0xa   :  { %29 = dma.hbm_to_vmem [thread:$0]  %s22_s28, 256, %s24_s8, [#allocation4], %s661_s9, %s661_s9, %s662_s10  }
   0xb   :  { %s663_s13 = smov [#allocation8]   ;;  %s58_s16 = sshll.u32 %s733_s3, 4  ;;  %s59_s16 = int_to_ptr.hbm [resolvable:$true] %s58_s16 }
   0xc   :  { %s50_s14 = sshll.u32 %s663_s13, 4  ;;  %s664_s17 = smov [#allocation9]   ;;  %s51_s14 = int_to_ptr.vmem [resolvable:$true] %s50_s14 }
   0xd   :  { %53 = dma.hbm_to_vmem [thread:$0]  %s49_s12, 64, %s51_s14, [#allocation7]  }
   0xe   :  { %s60_s18 = sshll.u32 %s664_s17, 4  ;;  %s61_s18 = int_to_ptr.vmem [resolvable:$true] %s60_s18 }
   0xf   :  { %66 = dma.hbm_to_vmem [thread:$0]  %s59_s16, 8192, %s61_s18, [#allocation10], %s661_s9, %s661_s9, %s662_s10  }
  0x10   :  { %647 = dma.done.wait [#allocation4], 256  }
  0x11   :  { %648 = vsyncadd [#allocation4], 4294967040 }
  0x12   :  { %649 = dma.done.wait [#allocation7], 8256  }
  0x13   :  { %650 = vsyncadd [#allocation7], 4294959040 }
  0x14   :  { %651 = dma.done.wait [#allocation10], 8192  }
  0x15   :  { %652 = vsyncadd [#allocation10], 4294959104  ;;  %v90_v0 = vld [vmem:[#allocation3] sm:$0xff]  ;;  %v91_v1 = vld [vmem:[#allocation3 + $0x8] sm:$0xff]  ;;  %vm106_vm0 = vcmask 1043456   ;;  %v665_v37 = vmov 0.0  }
  0x16   :  { %v194_v2 = vld [vmem:[#allocation6 + $0x1e0] sm:$0xff]  ;;  %95 = vst [vmem:[#allocation1] ss:$2 sm:$0xff] %v90_v0  ;;  %v195_v3 = vld [vmem:[#allocation6 + $0x1e8] sm:$0xff]  ;;  %v196_v4 = vld [vmem:[#allocation6 + $0x1f0] sm:$0xff]  ;;  %vm123_vm1 = vcmask 1041409  }
  0x17   :  { %208 = vmatpush.msra.mxu0 %v194_v2  ;;  %v197_v5 = vld [vmem:[#allocation6 + $0x1f8] sm:$0xff]  ;;  %99 = vst [vmem:[#allocation1 + $0x10] ss:$2 sm:$0xff] %v91_v1  ;;  %228 = vmatpush.msra.mxu1 %v195_v3  ;;  %v190_v6 = vld [vmem:[#allocation6 + $0x1c0] sm:$0xff]  ;;  %v191_v7 = vld [vmem:[#allocation6 + $0x1c8] sm:$0xff]  ;;  %vm127_vm2 = vcmask 25600  }
  0x18   :  { %248 = vmatpush.msra.mxu2 %v196_v4  ;;  %v192_v8 = vld [vmem:[#allocation6 + $0x1d0] sm:$0xff]  ;;  %268 = vmatpush.msra.mxu3 %v197_v5  ;;  %v193_v9 = vld [vmem:[#allocation6 + $0x1d8] sm:$0xff]  ;;  %v186_v10 = vld [vmem:[#allocation6 + $0x1a0] sm:$0xff]  ;;  %89 = vst [vmem:[#allocation2] sm:$0xff] %v665_v37  ;;  %vm299_vm3 = vcmask 1041408   ;;  %vm301_vm4 = vcmask 1045508  }
  0x19   :  { %209 = vmatpush.msra.mxu0 %v190_v6  ;;  %v187_v11 = vld [vmem:[#allocation6 + $0x1a8] sm:$0xff]  ;;  %229 = vmatpush.msra.mxu1 %v191_v7  ;;  %v188_v12 = vld [vmem:[#allocation6 + $0x1b0] sm:$0xff]  ;;  %v189_v13 = vld [vmem:[#allocation6 + $0x1b8] sm:$0xff]  ;;  %s666_s2 = smov [#allocation12]   ;;  %s474_s21 = sshll.u32 %s736_s6, 4  ;;  %s475_s21 = int_to_ptr.hbm [resolvable:$true] %s474_s21 }
  0x1a   :  { %249 = vmatpush.msra.mxu2 %v192_v8  ;;  %v182_v14 = vld [vmem:[#allocation6 + $0x180] sm:$0xff]  ;;  %269 = vmatpush.msra.mxu3 %v193_v9  ;;  %v183_v15 = vld [vmem:[#allocation6 + $0x188] sm:$0xff]  ;;  %v184_v16 = vld [vmem:[#allocation6 + $0x190] sm:$0xff]  ;;  %s472_s3 = sshll.u32 %s666_s2, 4  ;;  %s667_s24 = smov [#allocation11]   ;;  %s473_s3 = int_to_ptr.vmem [resolvable:$true] %s472_s3 }
  0x1b   :  { %210 = vmatpush.msra.mxu0 %v186_v10  ;;  %230 = vmatpush.msra.mxu1 %v187_v11  ;;  %v185_v17 = vld [vmem:[#allocation6 + $0x198] sm:$0xff]  ;;  %v178_v28 = vld [vmem:[#allocation6 + $0x160] sm:$0xff]  ;;  %v179_v29 = vld [vmem:[#allocation6 + $0x168] sm:$0xff]  ;;  %s461_s25 = sshll.u32 %s667_s24, 4  ;;  %s463_s28 = sshll.u32 %s735_s5, 4  ;;  %s462_s25 = int_to_ptr.vmem [resolvable:$true] %s461_s25  ;;  %s464_s28 = int_to_ptr.hbm [resolvable:$true] %s463_s28 }
  0x1c   :  { %250 = vmatpush.msra.mxu2 %v188_v12  ;;  %270 = vmatpush.msra.mxu3 %v189_v13  ;;  %v180_v30 = vld [vmem:[#allocation6 + $0x170] sm:$0xff]  ;;  %v181_v31 = vld [vmem:[#allocation6 + $0x178] sm:$0xff]  ;;  %v174_v32 = vld [vmem:[#allocation6 + $0x140] sm:$0xff] }
  0x1d   :  { %211 = vmatpush.msra.mxu0 %v182_v14  ;;  %v96_v18 = vld.sshfl [vmem:[#allocation1] sm:$0xff pattern:$0x75316420]  ;;  %v97_v19 = vld.sshfl [vmem:[#allocation1 + $0x8] sm:$0xff pattern:$0x75316420]  ;;  %231 = vmatpush.msra.mxu1 %v183_v15 }
  0x1e   :  { %251 = vmatpush.msra.mxu2 %v184_v16  ;;  %v107_v20 = vsel %vm106_vm0, %v96_v18, 0.0  ;;  %v108_v21 = vsel %vm106_vm0, %v97_v19, 0.0  ;;  %271 = vmatpush.msra.mxu3 %v185_v17  ;;  %v100_v23 = vld.sshfl [vmem:[#allocation1 + $0x10] sm:$0xff pattern:$0x75316420]  ;;  %v175_v33 = vld [vmem:[#allocation6 + $0x148] sm:$0xff] }
  0x1f   :  { %v109_v22 = vadd.f32 %v108_v21, %v107_v20  ;;  %v101_v24 = vld.sshfl [vmem:[#allocation1 + $0x18] sm:$0xff pattern:$0x75316420]  ;;  %v112_v25 = vsel %vm106_vm0, %v100_v23, 0.0  ;;  %212 = vmatpush.msra.mxu0 %v178_v28  ;;  %232 = vmatpush.msra.mxu1 %v179_v29  ;;  %v176_v34 = vld [vmem:[#allocation6 + $0x150] sm:$0xff]  ;;  %v170_v36 = vld [vmem:[#allocation6 + $0x120] sm:$0xff] }
  0x20   :  { %v113_v26 = vsel %vm106_vm0, %v101_v24, 0.0  ;;  %252 = vmatpush.msra.mxu2 %v180_v30  ;;  %272 = vmatpush.msra.mxu3 %v181_v31  ;;  %v177_v35 = vld [vmem:[#allocation6 + $0x158] sm:$0xff]  ;;  %v171_v38 = vld [vmem:[#allocation6 + $0x128] sm:$0xff]  ;;  %v172_v39 = vld [vmem:[#allocation6 + $0x130] sm:$0xff] }
  0x21   :  { %110 = vadd.xlane.f32.xlu0 %v109_v22  ;;  %v114_v27 = vadd.f32 %v113_v26, %v112_v25  ;;  %213 = vmatpush.msra.mxu0 %v174_v32  ;;  %v173_v40 = vld [vmem:[#allocation6 + $0x138] sm:$0xff]  ;;  %v166_v41 = vld [vmem:[#allocation6 + $0x100] sm:$0xff]  ;;  %v167_v42 = vld [vmem:[#allocation6 + $0x108] sm:$0xff]  ;;  %v119_v32 = vlaneseq }
  0x22   :  { %233 = vmatpush.msra.mxu1 %v175_v33  ;;  %253 = vmatpush.msra.mxu2 %v176_v34  ;;  %v168_v43 = vld [vmem:[#allocation6 + $0x110] sm:$0xff]  ;;  %v169_v44 = vld [vmem:[#allocation6 + $0x118] sm:$0xff]  ;;  %v162_v45 = vld [vmem:[#allocation6 + $0xe0] sm:$0xff] }
  0x23   :  { %273 = vmatpush.msra.mxu3 %v177_v35  ;;  %214 = vmatpush.msra.mxu0 %v170_v36  ;;  %v163_v46 = vld [vmem:[#allocation6 + $0xe8] sm:$0xff]  ;;  %v164_v47 = vld [vmem:[#allocation6 + $0xf0] sm:$0xff]  ;;  %v165_v48 = vld [vmem:[#allocation6 + $0xf8] sm:$0xff] }
  0x24   :  { %234 = vmatpush.msra.mxu1 %v171_v38  ;;  %254 = vmatpush.msra.mxu2 %v172_v39  ;;  %v158_v49 = vld [vmem:[#allocation6 + $0xc0] sm:$0xff]  ;;  %v159_v50 = vld [vmem:[#allocation6 + $0xc8] sm:$0xff]  ;;  %v160_v51 = vld [vmem:[#allocation6 + $0xd0] sm:$0xff] }
  0x25   :  { %274 = vmatpush.msra.mxu3 %v173_v40  ;;  %215 = vmatpush.msra.mxu0 %v166_v41  ;;  %v161_v52 = vld [vmem:[#allocation6 + $0xd8] sm:$0xff]  ;;  %v154_v53 = vld [vmem:[#allocation6 + $0xa0] sm:$0xff]  ;;  %v155_v54 = vld [vmem:[#allocation6 + $0xa8] sm:$0xff]  ;;  %v120_v41 = vand.u32 127, %v119_v32 }
  0x26   :  { %235 = vmatpush.msra.mxu1 %v167_v42  ;;  %255 = vmatpush.msra.mxu2 %v168_v43  ;;  %v156_v55 = vld [vmem:[#allocation6 + $0xb0] sm:$0xff]  ;;  %v157_v56 = vld [vmem:[#allocation6 + $0xb8] sm:$0xff]  ;;  %v150_v57 = vld [vmem:[#allocation6 + $0x80] sm:$0xff] }
  0x27   :  { %275 = vmatpush.msra.mxu3 %v169_v44  ;;  %216 = vmatpush.msra.mxu0 %v162_v45  ;;  %v151_v58 = vld [vmem:[#allocation6 + $0x88] sm:$0xff]  ;;  %v152_v59 = vld [vmem:[#allocation6 + $0x90] sm:$0xff]  ;;  %v153_v60 = vld [vmem:[#allocation6 + $0x98] sm:$0xff] }
  0x28   :  { %236 = vmatpush.msra.mxu1 %v163_v46  ;;  %256 = vmatpush.msra.mxu2 %v164_v47  ;;  %v146_v61 = vld [vmem:[#allocation6 + $0x60] sm:$0xff]  ;;  %v147_v62 = vld [vmem:[#allocation6 + $0x68] sm:$0xff]  ;;  %v148_v63 = vld [vmem:[#allocation6 + $0x70] sm:$0xff] }
  0x29   :  { %115 = vadd.xlane.f32.xlu0 %v114_v27  ;;  %276 = vmatpush.msra.mxu3 %v165_v48  ;;  %v149_v0 = vld [vmem:[#allocation6 + $0x78] sm:$0xff]  ;;  %v142_v1 = vld [vmem:[#allocation6 + $0x40] sm:$0xff]  ;;  %v143_v2 = vld [vmem:[#allocation6 + $0x48] sm:$0xff] }
  0x2a   :  { %217 = vmatpush.msra.mxu0 %v158_v49  ;;  %237 = vmatpush.msra.mxu1 %v159_v50  ;;  %v144_v3 = vld [vmem:[#allocation6 + $0x50] sm:$0xff]  ;;  %v145_v4 = vld [vmem:[#allocation6 + $0x58] sm:$0xff]  ;;  %v138_v5 = vld [vmem:[#allocation6 + $0x20] sm:$0xff] }
  0x2b   :  { %257 = vmatpush.msra.mxu2 %v160_v51  ;;  %277 = vmatpush.msra.mxu3 %v161_v52  ;;  %v139_v6 = vld [vmem:[#allocation6 + $0x28] sm:$0xff]  ;;  %v140_v7 = vld [vmem:[#allocation6 + $0x30] sm:$0xff]  ;;  %v141_v8 = vld [vmem:[#allocation6 + $0x38] sm:$0xff] }
  0x2c   :  { %218 = vmatpush.msra.mxu0 %v154_v53  ;;  %238 = vmatpush.msra.mxu1 %v155_v54  ;;  %v134_v9 = vld [vmem:[#allocation6] sm:$0xff]  ;;  %v135_v10 = vld [vmem:[#allocation6 + $0x8] sm:$0xff]  ;;  %v136_v11 = vld [vmem:[#allocation6 + $0x10] sm:$0xff] }
  0x2d   :  { %258 = vmatpush.msra.mxu2 %v156_v55  ;;  %278 = vmatpush.msra.mxu3 %v157_v56  ;;  %v137_v12 = vld [vmem:[#allocation6 + $0x18] sm:$0xff]  ;;  %v319_v17 = vld [vmem:[#allocation9 + $0x68] sm:$0xff]  ;;  %v318_v20 = vld [vmem:[#allocation9 + $0x60] sm:$0xff] }
  0x2e   :  { %219 = vmatpush.msra.mxu0 %v150_v57  ;;  %239 = vmatpush.msra.mxu1 %v151_v58  ;;  %v321_v13 = vld [vmem:[#allocation9 + $0x78] sm:$0xff]  ;;  %v320_v15 = vld [vmem:[#allocation9 + $0x70] sm:$0xff]  ;;  %v335_v18 = vld [vmem:[#allocation9 + $0xe8] sm:$0xff] }
  0x2f   :  { %259 = vmatpush.msra.mxu2 %v152_v59  ;;  %279 = vmatpush.msra.mxu3 %v153_v60  ;;  %v337_v14 = vld [vmem:[#allocation9 + $0xf8] sm:$0xff]  ;;  %v336_v16 = vld [vmem:[#allocation9 + $0xf0] sm:$0xff]  ;;  %v334_v22 = vld [vmem:[#allocation9 + $0xe0] sm:$0xff] }
  0x30   :  { %220 = vmatpush.msra.mxu0 %v146_v61  ;;  %240 = vmatpush.msra.mxu1 %v147_v62  ;;  %v353_v19 = vld [vmem:[#allocation9 + $0x178] sm:$0xff]  ;;  %v352_v23 = vld [vmem:[#allocation9 + $0x170] sm:$0xff]  ;;  %v351_v25 = vld [vmem:[#allocation9 + $0x168] sm:$0xff] }
  0x31   :  { %260 = vmatpush.msra.mxu2 %v148_v63  ;;  %280 = vmatpush.msra.mxu3 %v149_v0  ;;  %v369_v21 = vld [vmem:[#allocation9 + $0x1f8] sm:$0xff]  ;;  %v368_v24 = vld [vmem:[#allocation9 + $0x1f0] sm:$0xff]  ;;  %v367_v26 = vld [vmem:[#allocation9 + $0x1e8] sm:$0xff] }
  0x32   :  { %221 = vmatpush.msra.mxu0 %v142_v1  ;;  %241 = vmatpush.msra.mxu1 %v143_v2  ;;  %v317_v27 = vld [vmem:[#allocation9 + $0x58] sm:$0xff]  ;;  %v350_v30 = vld [vmem:[#allocation9 + $0x160] sm:$0xff]  ;;  %v316_v33 = vld [vmem:[#allocation9 + $0x50] sm:$0xff] }
  0x33   :  { %261 = vmatpush.msra.mxu2 %v144_v3  ;;  %281 = vmatpush.msra.mxu3 %v145_v4  ;;  %v333_v28 = vld [vmem:[#allocation9 + $0xd8] sm:$0xff]  ;;  %v366_v31 = vld [vmem:[#allocation9 + $0x1e0] sm:$0xff]  ;;  %v332_v34 = vld [vmem:[#allocation9 + $0xd0] sm:$0xff] }
  0x34   :  { %222 = vmatpush.msra.mxu0 %v138_v5  ;;  %242 = vmatpush.msra.mxu1 %v139_v6  ;;  %v349_v35 = vld [vmem:[#allocation9 + $0x158] sm:$0xff]  ;;  %v315_v37 = vld [vmem:[#allocation9 + $0x48] sm:$0xff]  ;;  %v348_v39 = vld [vmem:[#allocation9 + $0x150] sm:$0xff] }
  0x35   :  { %262 = vmatpush.msra.mxu2 %v140_v7  ;;  %282 = vmatpush.msra.mxu3 %v141_v8  ;;  %v365_v36 = vld [vmem:[#allocation9 + $0x1d8] sm:$0xff]  ;;  %v331_v38 = vld [vmem:[#allocation9 + $0xc8] sm:$0xff]  ;;  %v364_v40 = vld [vmem:[#allocation9 + $0x1d0] sm:$0xff] }
  0x36   :  { %223 = vmatpush.msra.mxu0 %v134_v9  ;;  %243 = vmatpush.msra.mxu1 %v135_v10  ;;  %v314_v42 = vld [vmem:[#allocation9 + $0x40] sm:$0xff]  ;;  %v347_v44 = vld [vmem:[#allocation9 + $0x148] sm:$0xff]  ;;  %v313_v46 = vld [vmem:[#allocation9 + $0x38] sm:$0xff] }
  0x37   :  { %263 = vmatpush.msra.mxu2 %v136_v11  ;;  %283 = vmatpush.msra.mxu3 %v137_v12  ;;  %v330_v43 = vld [vmem:[#allocation9 + $0xc0] sm:$0xff]  ;;  %v363_v45 = vld [vmem:[#allocation9 + $0x1c8] sm:$0xff]  ;;  %v329_v47 = vld [vmem:[#allocation9 + $0xb8] sm:$0xff] }
  0x38   :  { %370 = vmatpush.msrb.mxu0 %v321_v13  ;;  %390 = vmatpush.msrb.mxu1 %v337_v14  ;;  %v346_v49 = vld [vmem:[#allocation9 + $0x140] sm:$0xff]  ;;  %v312_v54 = vld [vmem:[#allocation9 + $0x30] sm:$0xff]  ;;  %v345_v56 = vld [vmem:[#allocation9 + $0x138] sm:$0xff] }
  0x39   :  { %410 = vmatpush.msrb.mxu2 %v353_v19  ;;  %430 = vmatpush.msrb.mxu3 %v369_v21  ;;  %v362_v50 = vld [vmem:[#allocation9 + $0x1c0] sm:$0xff]  ;;  %v328_v55 = vld [vmem:[#allocation9 + $0xb0] sm:$0xff]  ;;  %v361_v57 = vld [vmem:[#allocation9 + $0x1b8] sm:$0xff] }
  0x3a   :  { %371 = vmatpush.msrb.mxu0 %v320_v15  ;;  %391 = vmatpush.msrb.mxu1 %v336_v16  ;;  %v92_v52 = vld [vmem:[#allocation2] sm:$0x3]  ;;  %v311_v59 = vld [vmem:[#allocation9 + $0x28] sm:$0xff]  ;;  %v344_v62 = vld [vmem:[#allocation9 + $0x130] sm:$0xff] }
  0x3b   :  { %411 = vmatpush.msrb.mxu2 %v352_v23  ;;  %431 = vmatpush.msrb.mxu3 %v368_v24  ;;  %v327_v60 = vld [vmem:[#allocation9 + $0xa8] sm:$0xff]  ;;  %v360_v63 = vld [vmem:[#allocation9 + $0x1b0] sm:$0xff]  ;;  %v310_v0 = vld [vmem:[#allocation9 + $0x20] sm:$0xff] }
  0x3c   :  { %372 = vmatpush.msrb.mxu0 %v319_v17  ;;  %392 = vmatpush.msrb.mxu1 %v335_v18  ;;  %v326_v1 = vld [vmem:[#allocation9 + $0xa0] sm:$0xff]  ;;  %v309_v2 = vld [vmem:[#allocation9 + $0x18] sm:$0xff]  ;;  %v308_v6 = vld [vmem:[#allocation9 + $0x10] sm:$0xff] }
  0x3d   :  { %412 = vmatpush.msrb.mxu2 %v351_v25  ;;  %432 = vmatpush.msrb.mxu3 %v367_v26  ;;  %v325_v3 = vld [vmem:[#allocation9 + $0x98] sm:$0xff]  ;;  %v324_v7 = vld [vmem:[#allocation9 + $0x90] sm:$0xff]  ;;  %v343_v8 = vld [vmem:[#allocation9 + $0x128] sm:$0xff] }
  0x3e   :  { %373 = vmatpush.msrb.mxu0 %v318_v20  ;;  %393 = vmatpush.msrb.mxu1 %v334_v22  ;;  %v359_v9 = vld [vmem:[#allocation9 + $0x1a8] sm:$0xff]  ;;  %v342_v12 = vld [vmem:[#allocation9 + $0x120] sm:$0xff]  ;;  %v341_v16 = vld [vmem:[#allocation9 + $0x118] sm:$0xff] }
  0x3f   :  { %413 = vmatpush.msrb.mxu2 %v350_v30  ;;  %433 = vmatpush.msrb.mxu3 %v366_v31  ;;  %v307_v10 = vld [vmem:[#allocation9 + $0x8] sm:$0xff]  ;;  %v358_v13 = vld [vmem:[#allocation9 + $0x1a0] sm:$0xff]  ;;  %v357_v17 = vld [vmem:[#allocation9 + $0x198] sm:$0xff] }
  0x40   :  { %374 = vmatpush.msrb.mxu0 %v317_v27  ;;  %394 = vmatpush.msrb.mxu1 %v333_v28  ;;  %v323_v11 = vld [vmem:[#allocation9 + $0x88] sm:$0xff]  ;;  %v306_v14 = vld [vmem:[#allocation9] sm:$0xff]  ;;  %v340_v18 = vld [vmem:[#allocation9 + $0x110] sm:$0xff] }
  0x41   :  { %414 = vmatpush.msrb.mxu2 %v349_v35  ;;  %434 = vmatpush.msrb.mxu3 %v365_v36  ;;  %v322_v15 = vld [vmem:[#allocation9 + $0x80] sm:$0xff]  ;;  %v356_v19 = vld [vmem:[#allocation9 + $0x190] sm:$0xff]  ;;  %v339_v20 = vld [vmem:[#allocation9 + $0x108] sm:$0xff] }
  0x42   :  { %375 = vmatpush.msrb.mxu0 %v316_v33  ;;  %395 = vmatpush.msrb.mxu1 %v332_v34  ;;  %v355_v21 = vld [vmem:[#allocation9 + $0x188] sm:$0xff]  ;;  %v338_v22 = vld [vmem:[#allocation9 + $0x100] sm:$0xff]  ;;  %v198_v24 = vld [vmem:[#allocation8] sm:$0xf] }
  0x43   :  { %415 = vmatpush.msrb.mxu2 %v348_v39  ;;  %435 = vmatpush.msrb.mxu3 %v364_v40  ;;  %v354_v23 = vld [vmem:[#allocation9 + $0x180] sm:$0xff]  ;;  %v200_v25 = vperm.slane %v198_v24, 0  ;;  %v201_v26 = vperm.slane %v198_v24, 1  ;;  %v202_v33 = vperm.slane %v198_v24, 2  ;;  %v203_v34 = vperm.slane %v198_v24, 3 }
  0x44   :  { %376 = vmatpush.msrb.mxu0 %v315_v37  ;;  %396 = vmatpush.msrb.mxu1 %v331_v38 }
  0x45   :  { %416 = vmatpush.msrb.mxu2 %v347_v44  ;;  %436 = vmatpush.msrb.mxu3 %v363_v45 }
  0x46   :  { %377 = vmatpush.msrb.mxu0 %v314_v42  ;;  %397 = vmatpush.msrb.mxu1 %v330_v43 }
  0x47   :  { %417 = vmatpush.msrb.mxu2 %v346_v49  ;;  %437 = vmatpush.msrb.mxu3 %v362_v50 }
  0x48   :  { %378 = vmatpush.msrb.mxu0 %v313_v46  ;;  %398 = vmatpush.msrb.mxu1 %v329_v47 }
  0x49   :  { %418 = vmatpush.msrb.mxu2 %v345_v56  ;;  %438 = vmatpush.msrb.mxu3 %v361_v57 }
  0x4a   :  { %379 = vmatpush.msrb.mxu0 %v312_v54  ;;  %399 = vmatpush.msrb.mxu1 %v328_v55 }
  0x4b   :  { %419 = vmatpush.msrb.mxu2 %v344_v62  ;;  %439 = vmatpush.msrb.mxu3 %v360_v63 }
  0x4c   :  { %380 = vmatpush.msrb.mxu0 %v311_v59  ;;  %400 = vmatpush.msrb.mxu1 %v327_v60 }
  0x4d   :  { %420 = vmatpush.msrb.mxu2 %v343_v8  ;;  %440 = vmatpush.msrb.mxu3 %v359_v9 }
  0x4e   :  { %381 = vmatpush.msrb.mxu0 %v310_v0  ;;  %401 = vmatpush.msrb.mxu1 %v326_v1 }
  0x4f   :  { %421 = vmatpush.msrb.mxu2 %v342_v12  ;;  %441 = vmatpush.msrb.mxu3 %v358_v13 }
  0x50   :  { %382 = vmatpush.msrb.mxu0 %v309_v2  ;;  %402 = vmatpush.msrb.mxu1 %v325_v3 }
  0x51   :  { %422 = vmatpush.msrb.mxu2 %v341_v16  ;;  %442 = vmatpush.msrb.mxu3 %v357_v17 }
  0x52   :  { %383 = vmatpush.msrb.mxu0 %v308_v6  ;;  %403 = vmatpush.msrb.mxu1 %v324_v7 }
  0x53   :  { %423 = vmatpush.msrb.mxu2 %v340_v18  ;;  %443 = vmatpush.msrb.mxu3 %v356_v19 }
  0x54   :  { %384 = vmatpush.msrb.mxu0 %v307_v10  ;;  %404 = vmatpush.msrb.mxu1 %v323_v11 }
  0x55   :  { %424 = vmatpush.msrb.mxu2 %v339_v20  ;;  %444 = vmatpush.msrb.mxu3 %v355_v21 }
  0x56   :  { %385 = vmatpush.msrb.mxu0 %v306_v14  ;;  %405 = vmatpush.msrb.mxu1 %v322_v15 }
  0x57   :  { %425 = vmatpush.msrb.mxu2 %v338_v22  ;;  %445 = vmatpush.msrb.mxu3 %v354_v23 }
  0x94   :  { %v111_v29 = vpop.xlane.xlu0 %110 }
  0x95   :  { %v121_v51 = vperm.slane %v111_v29, %v120_v41 }
  0x9c   :  { %v116_v48 = vpop.xlane.xlu0 %115 }
  0x9d   :  { %v122_v53 = vperm.slane %v116_v48, %v120_v41 }
  0x9f   :  { %v124_v58 = vsel %vm123_vm1, %v122_v53, %v121_v51 }
  0xa0   :  { %v126_v61 = vadd.f32 %v124_v58, %v92_v52  ;;  %v502_v52 = vld [vmem:[%s734_s4] ss:$0 sm:$0xff] }
  0xa2   :  { %128 = vst.msk [vmem:[#allocation2] sm:$0x3] %vm127_vm2, %v126_v61 }
  0xa9   :  { %v132_v4 = vld [vmem:[#allocation2] sm:$0xff] }
  0xaa   :  { %v133_v5 = vmul.f32 0.00390625, %v132_v4 }
  0xac   :  { %224 = vmatmul.f32.vlgmr.msra.gmra.mxu0 %v133_v5  ;;  %244 = vmatmul.f32.vlgmr.msra.gmra.mxu1 %v133_v5 }
  0xad   :  { %264 = vmatmul.f32.vlgmr.msra.gmra.mxu2 %v133_v5  ;;  %284 = vmatmul.f32.vlgmr.msra.gmra.mxu3 %v133_v5 }
 0x129   :  { %v225_v27 = vpop.f32.mrf.mxu0  ;;  %v245_v28 = vpop.f32.mrf.mxu1 }
 0x12a   :  { %v226_v29 = vadd.f32 %v225_v27, %v200_v25  ;;  %v246_v30 = vadd.f32 %v245_v28, %v201_v26 }
 0x12c   :  { %v288_v31 = vmax.f32 %v226_v29, 0.0  ;;  %v289_v32 = vmax.f32 %v246_v30, 0.0 }
 0x12e   :  { %386 = vmatmul.f32.vlgmr.msrb.gmra.mxu0 %v288_v31  ;;  %406 = vmatmul.f32.vlgmr.msrb.gmra.mxu1 %v289_v32  ;;  %v296_v39 = vrot.slane %v289_v32, 6 }
 0x130   :  { %v265_v35 = vpop.f32.mrf.mxu2  ;;  %v285_v36 = vpop.f32.mrf.mxu3  ;;  %v300_v44 = vsel %vm299_vm3, %v288_v31, %v296_v39 }
 0x131   :  { %v266_v37 = vadd.f32 %v265_v35, %v202_v33  ;;  %v286_v38 = vadd.f32 %v285_v36, %v203_v34 }
 0x133   :  { %v290_v40 = vmax.f32 %v266_v37, 0.0  ;;  %v291_v41 = vmax.f32 %v286_v38, 0.0 }
 0x135   :  { %v297_v42 = vrot.slane %v290_v40, 4  ;;  %v298_v43 = vrot.slane %v291_v41, 2  ;;  %426 = vmatmul.f32.vlgmr.msrb.gmra.mxu2 %v290_v40  ;;  %446 = vmatmul.f32.vlgmr.msrb.gmra.mxu3 %v291_v41 }
 0x137   :  { %v302_v45 = vsel %vm301_vm4, %v297_v42, %v298_v43 }
 0x138   :  { %v303_v46 = vsel %vm106_vm0, %v300_v44, %v302_v45 }
 0x139   :  { %305 = vst [vmem:[#allocation12] sm:$0xff] %v303_v46 }
 0x13a   :  { %477 = dma.vmem_to_hbm [thread:$0]  %s473_s3, 128, %s475_s21, [#allocation13]  }
 0x1ab   :  { %v387_v47 = vpop.f32.mrf.mxu0  ;;  %v407_v48 = vpop.f32.mrf.mxu1 }
 0x1ac   :  { %v408_v49 = vadd.f32 %v407_v48, %v387_v47 }
 0x1b8   :  { %v427_v50 = vpop.f32.mrf.mxu2  ;;  %v447_v53 = vpop.f32.mrf.mxu3 }
 0x1b9   :  { %v428_v51 = vadd.f32 %v427_v50, %v408_v49 }
 0x1bb   :  { %v448_v54 = vadd.f32 %v447_v53, %v428_v51 }
 0x1bd   :  { %v454_v55 = vadd.f32 %v502_v52, %v448_v54 }
 0x1bf   :  { %455 = vst [vmem:[#allocation11] sm:$0x3] %v454_v55 }
 0x1c0   :  { %466 = dma.vmem_to_hbm [thread:$0]  %s462_s25, 32, %s464_s28, [#allocation5]  }
 0x1c1   :  { %653 = dma.done.wait [#allocation5], 32  }
 0x1c2   :  { %654 = vsyncadd [#allocation5], 4294967264 }
 0x1c3   :  { %655 = dma.done.wait [#allocation13], 128  }
 0x1c4   :  { %656 = vsyncadd [#allocation13], 4294967168 }
 0x1c5   :  { %486 = vsyncpa [#allocation4], 1 }
 0x1c6   :  { %487 = vsyncpa [#allocation7], 1 }
 0x1c7   :  { %488 = vsyncpa [#allocation10], 1 }
 0x1c8   :  { %489 = vsyncpa [#allocation5], 1 }
 0x1c9   :  { %490 = vsyncpa [#allocation13], 1 }

// kernel: tpu_custom_call.1
= control target key start
LH: loop header
LB: loop body
LE: loop exit
PB: predicated region body
PF: predicated region fallthrough
CT: control target
= control target key end

     0   :  { %12 = vsyncpa [#allocation4], 0  ;;  %s730_s0 = inlined_call_operand.hbm [shape: f32[2,4,256], index: 0, kind: input, shape index: {}]   ;;  %s731_s1 = inlined_call_operand.hbm [shape: f32[128,512], index: 1, kind: input, shape index: {}]   ;;  %s732_s2 = inlined_call_operand.hbm [shape: f32[1,512], index: 2, kind: input, shape index: {}]   ;;  %s733_s3 = inlined_call_operand.hbm [shape: f32[512,128], index: 3, kind: input, shape index: {}]   ;;  %s734_s4 = inlined_call_operand.vmem [shape: f32[1,128], index: 4, kind: input, shape index: {}]   ;;  %s735_s5 = inlined_call_operand.hbm [shape: f32[2,128], index: 5, kind: output, shape index: {0}]   ;;  %s736_s6 = inlined_call_operand.hbm [shape: f32[2,512], index: 6, kind: output, shape index: {1}]  }
   0x1   :  { %13 = vsyncpa [#allocation7], 0 }
   0x2   :  { %14 = vsyncpa [#allocation10], 0 }
   0x3   :  { %15 = vsyncpa [#allocation5], 0  ;;  %s34_s23 = sshll.u32 %s731_s1, 4  ;;  %s35_s23 = int_to_ptr.hbm [resolvable:$true] %s34_s23 }
   0x4   :  { %16 = vsyncpa [#allocation13], 0  ;;  %s657_s24 = smov [#allocation6]   ;;  %s21_s28 = sshll.u32 %s730_s0, 4  ;;  %s22_s28 = int_to_ptr.hbm [resolvable:$true] %s21_s28 }
   0x5   :  { %s36_s25 = sshll.u32 %s657_s24, 4  ;;  %s658_s29 = smov 512   ;;  %s37_s25 = int_to_ptr.vmem [resolvable:$true] %s36_s25 }
   0x6   :  { %s659_s30 = smov 32   ;;  %s660_s7 = smov [#allocation3]  }
   0x7   :  { %42 = dma.hbm_to_vmem [thread:$0]  %s35_s23, 8192, %s37_s25, [#allocation7], %s658_s29, %s658_s29, %s659_s30  }
   0x8   :  { %s23_s8 = sshll.u32 %s660_s7, 4  ;;  %s661_s9 = smov 128   ;;  %s24_s8 = int_to_ptr.vmem [resolvable:$true] %s23_s8 }
   0x9   :  { %s662_s10 = smov 8   ;;  %s48_s12 = sshll.u32 %s732_s2, 4  ;;  %s49_s12 = int_to_ptr.hbm [resolvable:$true] %s48_s12 }
   0xa   :  { %29 = dma.hbm_to_vmem [thread:$0]  %s22_s28, 256, %s24_s8, [#allocation4], %s661_s9, %s661_s9, %s662_s10  }
   0xb   :  { %s663_s13 = smov [#allocation8]   ;;  %s58_s16 = sshll.u32 %s733_s3, 4  ;;  %s59_s16 = int_to_ptr.hbm [resolvable:$true] %s58_s16 }
   0xc   :  { %s50_s14 = sshll.u32 %s663_s13, 4  ;;  %s664_s17 = smov [#allocation9]   ;;  %s51_s14 = int_to_ptr.vmem [resolvable:$true] %s50_s14 }
   0xd   :  { %53 = dma.hbm_to_vmem [thread:$0]  %s49_s12, 64, %s51_s14, [#allocation7]  }
   0xe   :  { %s60_s18 = sshll.u32 %s664_s17, 4  ;;  %s61_s18 = int_to_ptr.vmem [resolvable:$true] %s60_s18 }
   0xf   :  { %66 = dma.hbm_to_vmem [thread:$0]  %s59_s16, 8192, %s61_s18, [#allocation10], %s661_s9, %s661_s9, %s662_s10  }
  0x10   :  { %647 = dma.done.wait [#allocation4], 256  }
  0x11   :  { %648 = vsyncadd [#allocation4], 4294967040 }
  0x12   :  { %649 = dma.done.wait [#allocation7], 8256  }
  0x13   :  { %650 = vsyncadd [#allocation7], 4294959040 }
  0x14   :  { %651 = dma.done.wait [#allocation10], 8192  }
  0x15   :  { %652 = vsyncadd [#allocation10], 4294959104  ;;  %v90_v0 = vld [vmem:[#allocation3] sm:$0xff]  ;;  %v91_v1 = vld [vmem:[#allocation3 + $0x8] sm:$0xff]  ;;  %vm106_vm0 = vcmask 1043456   ;;  %v665_v37 = vmov 0.0  }
  0x16   :  { %v194_v2 = vld [vmem:[#allocation6 + $0x1e0] sm:$0xff]  ;;  %95 = vst [vmem:[#allocation1] ss:$2 sm:$0xff] %v90_v0  ;;  %v195_v3 = vld [vmem:[#allocation6 + $0x1e8] sm:$0xff]  ;;  %v196_v4 = vld [vmem:[#allocation6 + $0x1f0] sm:$0xff]  ;;  %vm123_vm1 = vcmask 1041409  }
  0x17   :  { %208 = vmatpush.msra.mxu0 %v194_v2  ;;  %v197_v5 = vld [vmem:[#allocation6 + $0x1f8] sm:$0xff]  ;;  %99 = vst [vmem:[#allocation1 + $0x10] ss:$2 sm:$0xff] %v91_v1  ;;  %228 = vmatpush.msra.mxu1 %v195_v3  ;;  %v190_v6 = vld [vmem:[#allocation6 + $0x1c0] sm:$0xff]  ;;  %v191_v7 = vld [vmem:[#allocation6 + $0x1c8] sm:$0xff]  ;;  %vm127_vm2 = vcmask 25600  }
  0x18   :  { %248 = vmatpush.msra.mxu2 %v196_v4  ;;  %v192_v8 = vld [vmem:[#allocation6 + $0x1d0] sm:$0xff]  ;;  %268 = vmatpush.msra.mxu3 %v197_v5  ;;  %v193_v9 = vld [vmem:[#allocation6 + $0x1d8] sm:$0xff]  ;;  %v186_v10 = vld [vmem:[#allocation6 + $0x1a0] sm:$0xff]  ;;  %89 = vst [vmem:[#allocation2] sm:$0xff] %v665_v37  ;;  %vm299_vm3 = vcmask 1041408   ;;  %vm301_vm4 = vcmask 1045508  }
  0x19   :  { %209 = vmatpush.msra.mxu0 %v190_v6  ;;  %v187_v11 = vld [vmem:[#allocation6 + $0x1a8] sm:$0xff]  ;;  %229 = vmatpush.msra.mxu1 %v191_v7  ;;  %v188_v12 = vld [vmem:[#allocation6 + $0x1b0] sm:$0xff]  ;;  %v189_v13 = vld [vmem:[#allocation6 + $0x1b8] sm:$0xff]  ;;  %s666_s2 = smov [#allocation12]   ;;  %s474_s21 = sshll.u32 %s736_s6, 4  ;;  %s475_s21 = int_to_ptr.hbm [resolvable:$true] %s474_s21 }
  0x1a   :  { %249 = vmatpush.msra.mxu2 %v192_v8  ;;  %v182_v14 = vld [vmem:[#allocation6 + $0x180] sm:$0xff]  ;;  %269 = vmatpush.msra.mxu3 %v193_v9  ;;  %v183_v15 = vld [vmem:[#allocation6 + $0x188] sm:$0xff]  ;;  %v184_v16 = vld [vmem:[#allocation6 + $0x190] sm:$0xff]  ;;  %s472_s3 = sshll.u32 %s666_s2, 4  ;;  %s667_s24 = smov [#allocation11]   ;;  %s473_s3 = int_to_ptr.vmem [resolvable:$true] %s472_s3 }
  0x1b   :  { %210 = vmatpush.msra.mxu0 %v186_v10  ;;  %230 = vmatpush.msra.mxu1 %v187_v11  ;;  %v185_v17 = vld [vmem:[#allocation6 + $0x198] sm:$0xff]  ;;  %v178_v28 = vld [vmem:[#allocation6 + $0x160] sm:$0xff]  ;;  %v179_v29 = vld [vmem:[#allocation6 + $0x168] sm:$0xff]  ;;  %s461_s25 = sshll.u32 %s667_s24, 4  ;;  %s463_s28 = sshll.u32 %s735_s5, 4  ;;  %s462_s25 = int_to_ptr.vmem [resolvable:$true] %s461_s25  ;;  %s464_s28 = int_to_ptr.hbm [resolvable:$true] %s463_s28 }
  0x1c   :  { %250 = vmatpush.msra.mxu2 %v188_v12  ;;  %270 = vmatpush.msra.mxu3 %v189_v13  ;;  %v180_v30 = vld [vmem:[#allocation6 + $0x170] sm:$0xff]  ;;  %v181_v31 = vld [vmem:[#allocation6 + $0x178] sm:$0xff]  ;;  %v174_v32 = vld [vmem:[#allocation6 + $0x140] sm:$0xff] }
  0x1d   :  { %211 = vmatpush.msra.mxu0 %v182_v14  ;;  %v96_v18 = vld.sshfl [vmem:[#allocation1] sm:$0xff pattern:$0x75316420]  ;;  %v97_v19 = vld.sshfl [vmem:[#allocation1 + $0x8] sm:$0xff pattern:$0x75316420]  ;;  %231 = vmatpush.msra.mxu1 %v183_v15 }
  0x1e   :  { %251 = vmatpush.msra.mxu2 %v184_v16  ;;  %v107_v20 = vsel %vm106_vm0, %v96_v18, 0.0  ;;  %v108_v21 = vsel %vm106_vm0, %v97_v19, 0.0  ;;  %271 = vmatpush.msra.mxu3 %v185_v17  ;;  %v100_v23 = vld.sshfl [vmem:[#allocation1 + $0x10] sm:$0xff pattern:$0x75316420]  ;;  %v175_v33 = vld [vmem:[#allocation6 + $0x148] sm:$0xff] }
  0x1f   :  { %v109_v22 = vadd.f32 %v108_v21, %v107_v20  ;;  %v101_v24 = vld.sshfl [vmem:[#allocation1 + $0x18] sm:$0xff pattern:$0x75316420]  ;;  %v112_v25 = vsel %vm106_vm0, %v100_v23, 0.0  ;;  %212 = vmatpush.msra.mxu0 %v178_v28  ;;  %232 = vmatpush.msra.mxu1 %v179_v29  ;;  %v176_v34 = vld [vmem:[#allocation6 + $0x150] sm:$0xff]  ;;  %v170_v36 = vld [vmem:[#allocation6 + $0x120] sm:$0xff] }
  0x20   :  { %v113_v26 = vsel %vm106_vm0, %v101_v24, 0.0  ;;  %252 = vmatpush.msra.mxu2 %v180_v30  ;;  %272 = vmatpush.msra.mxu3 %v181_v31  ;;  %v177_v35 = vld [vmem:[#allocation6 + $0x158] sm:$0xff]  ;;  %v171_v38 = vld [vmem:[#allocation6 + $0x128] sm:$0xff]  ;;  %v172_v39 = vld [vmem:[#allocation6 + $0x130] sm:$0xff] }
  0x21   :  { %110 = vadd.xlane.f32.xlu0 %v109_v22  ;;  %v114_v27 = vadd.f32 %v113_v26, %v112_v25  ;;  %213 = vmatpush.msra.mxu0 %v174_v32  ;;  %v173_v40 = vld [vmem:[#allocation6 + $0x138] sm:$0xff]  ;;  %v166_v41 = vld [vmem:[#allocation6 + $0x100] sm:$0xff]  ;;  %v167_v42 = vld [vmem:[#allocation6 + $0x108] sm:$0xff]  ;;  %v119_v32 = vlaneseq }
  0x22   :  { %233 = vmatpush.msra.mxu1 %v175_v33  ;;  %253 = vmatpush.msra.mxu2 %v176_v34  ;;  %v168_v43 = vld [vmem:[#allocation6 + $0x110] sm:$0xff]  ;;  %v169_v44 = vld [vmem:[#allocation6 + $0x118] sm:$0xff]  ;;  %v162_v45 = vld [vmem:[#allocation6 + $0xe0] sm:$0xff] }
  0x23   :  { %273 = vmatpush.msra.mxu3 %v177_v35  ;;  %214 = vmatpush.msra.mxu0 %v170_v36  ;;  %v163_v46 = vld [vmem:[#allocation6 + $0xe8] sm:$0xff]  ;;  %v164_v47 = vld [vmem:[#allocation6 + $0xf0] sm:$0xff]  ;;  %v165_v48 = vld [vmem:[#allocation6 + $0xf8] sm:$0xff] }
  0x24   :  { %234 = vmatpush.msra.mxu1 %v171_v38  ;;  %254 = vmatpush.msra.mxu2 %v172_v39  ;;  %v158_v49 = vld [vmem:[#allocation6 + $0xc0] sm:$0xff]  ;;  %v159_v50 = vld [vmem:[#allocation6 + $0xc8] sm:$0xff]  ;;  %v160_v51 = vld [vmem:[#allocation6 + $0xd0] sm:$0xff] }
  0x25   :  { %274 = vmatpush.msra.mxu3 %v173_v40  ;;  %215 = vmatpush.msra.mxu0 %v166_v41  ;;  %v161_v52 = vld [vmem:[#allocation6 + $0xd8] sm:$0xff]  ;;  %v154_v53 = vld [vmem:[#allocation6 + $0xa0] sm:$0xff]  ;;  %v155_v54 = vld [vmem:[#allocation6 + $0xa8] sm:$0xff]  ;;  %v120_v41 = vand.u32 127, %v119_v32 }
  0x26   :  { %235 = vmatpush.msra.mxu1 %v167_v42  ;;  %255 = vmatpush.msra.mxu2 %v168_v43  ;;  %v156_v55 = vld [vmem:[#allocation6 + $0xb0] sm:$0xff]  ;;  %v157_v56 = vld [vmem:[#allocation6 + $0xb8] sm:$0xff]  ;;  %v150_v57 = vld [vmem:[#allocation6 + $0x80] sm:$0xff] }
  0x27   :  { %275 = vmatpush.msra.mxu3 %v169_v44  ;;  %216 = vmatpush.msra.mxu0 %v162_v45  ;;  %v151_v58 = vld [vmem:[#allocation6 + $0x88] sm:$0xff]  ;;  %v152_v59 = vld [vmem:[#allocation6 + $0x90] sm:$0xff]  ;;  %v153_v60 = vld [vmem:[#allocation6 + $0x98] sm:$0xff] }
  0x28   :  { %236 = vmatpush.msra.mxu1 %v163_v46  ;;  %256 = vmatpush.msra.mxu2 %v164_v47  ;;  %v146_v61 = vld [vmem:[#allocation6 + $0x60] sm:$0xff]  ;;  %v147_v62 = vld [vmem:[#allocation6 + $0x68] sm:$0xff]  ;;  %v148_v63 = vld [vmem:[#allocation6 + $0x70] sm:$0xff] }
  0x29   :  { %115 = vadd.xlane.f32.xlu0 %v114_v27  ;;  %276 = vmatpush.msra.mxu3 %v165_v48  ;;  %v149_v0 = vld [vmem:[#allocation6 + $0x78] sm:$0xff]  ;;  %v142_v1 = vld [vmem:[#allocation6 + $0x40] sm:$0xff]  ;;  %v143_v2 = vld [vmem:[#allocation6 + $0x48] sm:$0xff] }
  0x2a   :  { %217 = vmatpush.msra.mxu0 %v158_v49  ;;  %237 = vmatpush.msra.mxu1 %v159_v50  ;;  %v144_v3 = vld [vmem:[#allocation6 + $0x50] sm:$0xff]  ;;  %v145_v4 = vld [vmem:[#allocation6 + $0x58] sm:$0xff]  ;;  %v138_v5 = vld [vmem:[#allocation6 + $0x20] sm:$0xff] }
  0x2b   :  { %257 = vmatpush.msra.mxu2 %v160_v51  ;;  %277 = vmatpush.msra.mxu3 %v161_v52  ;;  %v139_v6 = vld [vmem:[#allocation6 + $0x28] sm:$0xff]  ;;  %v140_v7 = vld [vmem:[#allocation6 + $0x30] sm:$0xff]  ;;  %v141_v8 = vld [vmem:[#allocation6 + $0x38] sm:$0xff] }
  0x2c   :  { %218 = vmatpush.msra.mxu0 %v154_v53  ;;  %238 = vmatpush.msra.mxu1 %v155_v54  ;;  %v134_v9 = vld [vmem:[#allocation6] sm:$0xff]  ;;  %v135_v10 = vld [vmem:[#allocation6 + $0x8] sm:$0xff]  ;;  %v136_v11 = vld [vmem:[#allocation6 + $0x10] sm:$0xff] }
  0x2d   :  { %258 = vmatpush.msra.mxu2 %v156_v55  ;;  %278 = vmatpush.msra.mxu3 %v157_v56  ;;  %v137_v12 = vld [vmem:[#allocation6 + $0x18] sm:$0xff]  ;;  %v319_v17 = vld [vmem:[#allocation9 + $0x68] sm:$0xff]  ;;  %v318_v20 = vld [vmem:[#allocation9 + $0x60] sm:$0xff] }
  0x2e   :  { %219 = vmatpush.msra.mxu0 %v150_v57  ;;  %239 = vmatpush.msra.mxu1 %v151_v58  ;;  %v321_v13 = vld [vmem:[#allocation9 + $0x78] sm:$0xff]  ;;  %v320_v15 = vld [vmem:[#allocation9 + $0x70] sm:$0xff]  ;;  %v335_v18 = vld [vmem:[#allocation9 + $0xe8] sm:$0xff] }
  0x2f   :  { %259 = vmatpush.msra.mxu2 %v152_v59  ;;  %279 = vmatpush.msra.mxu3 %v153_v60  ;;  %v337_v14 = vld [vmem:[#allocation9 + $0xf8] sm:$0xff]  ;;  %v336_v16 = vld [vmem:[#allocation9 + $0xf0] sm:$0xff]  ;;  %v334_v22 = vld [vmem:[#allocation9 + $0xe0] sm:$0xff] }
  0x30   :  { %220 = vmatpush.msra.mxu0 %v146_v61  ;;  %240 = vmatpush.msra.mxu1 %v147_v62  ;;  %v353_v19 = vld [vmem:[#allocation9 + $0x178] sm:$0xff]  ;;  %v352_v23 = vld [vmem:[#allocation9 + $0x170] sm:$0xff]  ;;  %v351_v25 = vld [vmem:[#allocation9 + $0x168] sm:$0xff] }
  0x31   :  { %260 = vmatpush.msra.mxu2 %v148_v63  ;;  %280 = vmatpush.msra.mxu3 %v149_v0  ;;  %v369_v21 = vld [vmem:[#allocation9 + $0x1f8] sm:$0xff]  ;;  %v368_v24 = vld [vmem:[#allocation9 + $0x1f0] sm:$0xff]  ;;  %v367_v26 = vld [vmem:[#allocation9 + $0x1e8] sm:$0xff] }
  0x32   :  { %221 = vmatpush.msra.mxu0 %v142_v1  ;;  %241 = vmatpush.msra.mxu1 %v143_v2  ;;  %v317_v27 = vld [vmem:[#allocation9 + $0x58] sm:$0xff]  ;;  %v350_v30 = vld [vmem:[#allocation9 + $0x160] sm:$0xff]  ;;  %v316_v33 = vld [vmem:[#allocation9 + $0x50] sm:$0xff] }
  0x33   :  { %261 = vmatpush.msra.mxu2 %v144_v3  ;;  %281 = vmatpush.msra.mxu3 %v145_v4  ;;  %v333_v28 = vld [vmem:[#allocation9 + $0xd8] sm:$0xff]  ;;  %v366_v31 = vld [vmem:[#allocation9 + $0x1e0] sm:$0xff]  ;;  %v332_v34 = vld [vmem:[#allocation9 + $0xd0] sm:$0xff] }
  0x34   :  { %222 = vmatpush.msra.mxu0 %v138_v5  ;;  %242 = vmatpush.msra.mxu1 %v139_v6  ;;  %v349_v35 = vld [vmem:[#allocation9 + $0x158] sm:$0xff]  ;;  %v315_v37 = vld [vmem:[#allocation9 + $0x48] sm:$0xff]  ;;  %v348_v39 = vld [vmem:[#allocation9 + $0x150] sm:$0xff] }
  0x35   :  { %262 = vmatpush.msra.mxu2 %v140_v7  ;;  %282 = vmatpush.msra.mxu3 %v141_v8  ;;  %v365_v36 = vld [vmem:[#allocation9 + $0x1d8] sm:$0xff]  ;;  %v331_v38 = vld [vmem:[#allocation9 + $0xc8] sm:$0xff]  ;;  %v364_v40 = vld [vmem:[#allocation9 + $0x1d0] sm:$0xff] }
  0x36   :  { %223 = vmatpush.msra.mxu0 %v134_v9  ;;  %243 = vmatpush.msra.mxu1 %v135_v10  ;;  %v314_v42 = vld [vmem:[#allocation9 + $0x40] sm:$0xff]  ;;  %v347_v44 = vld [vmem:[#allocation9 + $0x148] sm:$0xff]  ;;  %v313_v46 = vld [vmem:[#allocation9 + $0x38] sm:$0xff] }
  0x37   :  { %263 = vmatpush.msra.mxu2 %v136_v11  ;;  %283 = vmatpush.msra.mxu3 %v137_v12  ;;  %v330_v43 = vld [vmem:[#allocation9 + $0xc0] sm:$0xff]  ;;  %v363_v45 = vld [vmem:[#allocation9 + $0x1c8] sm:$0xff]  ;;  %v329_v47 = vld [vmem:[#allocation9 + $0xb8] sm:$0xff] }
  0x38   :  { %370 = vmatpush.msrb.mxu0 %v321_v13  ;;  %390 = vmatpush.msrb.mxu1 %v337_v14  ;;  %v346_v49 = vld [vmem:[#allocation9 + $0x140] sm:$0xff]  ;;  %v312_v54 = vld [vmem:[#allocation9 + $0x30] sm:$0xff]  ;;  %v345_v56 = vld [vmem:[#allocation9 + $0x138] sm:$0xff] }
  0x39   :  { %410 = vmatpush.msrb.mxu2 %v353_v19  ;;  %430 = vmatpush.msrb.mxu3 %v369_v21  ;;  %v362_v50 = vld [vmem:[#allocation9 + $0x1c0] sm:$0xff]  ;;  %v328_v55 = vld [vmem:[#allocation9 + $0xb0] sm:$0xff]  ;;  %v361_v57 = vld [vmem:[#allocation9 + $0x1b8] sm:$0xff] }
  0x3a   :  { %371 = vmatpush.msrb.mxu0 %v320_v15  ;;  %391 = vmatpush.msrb.mxu1 %v336_v16  ;;  %v92_v52 = vld [vmem:[#allocation2] sm:$0x3]  ;;  %v311_v59 = vld [vmem:[#allocation9 + $0x28] sm:$0xff]  ;;  %v344_v62 = vld [vmem:[#allocation9 + $0x130] sm:$0xff] }
  0x3b   :  { %411 = vmatpush.msrb.mxu2 %v352_v23  ;;  %431 = vmatpush.msrb.mxu3 %v368_v24  ;;  %v327_v60 = vld [vmem:[#allocation9 + $0xa8] sm:$0xff]  ;;  %v360_v63 = vld [vmem:[#allocation9 + $0x1b0] sm:$0xff]  ;;  %v310_v0 = vld [vmem:[#allocation9 + $0x20] sm:$0xff] }
  0x3c   :  { %372 = vmatpush.msrb.mxu0 %v319_v17  ;;  %392 = vmatpush.msrb.mxu1 %v335_v18  ;;  %v326_v1 = vld [vmem:[#allocation9 + $0xa0] sm:$0xff]  ;;  %v309_v2 = vld [vmem:[#allocation9 + $0x18] sm:$0xff]  ;;  %v308_v6 = vld [vmem:[#allocation9 + $0x10] sm:$0xff] }
  0x3d   :  { %412 = vmatpush.msrb.mxu2 %v351_v25  ;;  %432 = vmatpush.msrb.mxu3 %v367_v26  ;;  %v325_v3 = vld [vmem:[#allocation9 + $0x98] sm:$0xff]  ;;  %v324_v7 = vld [vmem:[#allocation9 + $0x90] sm:$0xff]  ;;  %v343_v8 = vld [vmem:[#allocation9 + $0x128] sm:$0xff] }
  0x3e   :  { %373 = vmatpush.msrb.mxu0 %v318_v20  ;;  %393 = vmatpush.msrb.mxu1 %v334_v22  ;;  %v359_v9 = vld [vmem:[#allocation9 + $0x1a8] sm:$0xff]  ;;  %v342_v12 = vld [vmem:[#allocation9 + $0x120] sm:$0xff]  ;;  %v341_v16 = vld [vmem:[#allocation9 + $0x118] sm:$0xff] }
  0x3f   :  { %413 = vmatpush.msrb.mxu2 %v350_v30  ;;  %433 = vmatpush.msrb.mxu3 %v366_v31  ;;  %v307_v10 = vld [vmem:[#allocation9 + $0x8] sm:$0xff]  ;;  %v358_v13 = vld [vmem:[#allocation9 + $0x1a0] sm:$0xff]  ;;  %v357_v17 = vld [vmem:[#allocation9 + $0x198] sm:$0xff] }
  0x40   :  { %374 = vmatpush.msrb.mxu0 %v317_v27  ;;  %394 = vmatpush.msrb.mxu1 %v333_v28  ;;  %v323_v11 = vld [vmem:[#allocation9 + $0x88] sm:$0xff]  ;;  %v306_v14 = vld [vmem:[#allocation9] sm:$0xff]  ;;  %v340_v18 = vld [vmem:[#allocation9 + $0x110] sm:$0xff] }
  0x41   :  { %414 = vmatpush.msrb.mxu2 %v349_v35  ;;  %434 = vmatpush.msrb.mxu3 %v365_v36  ;;  %v322_v15 = vld [vmem:[#allocation9 + $0x80] sm:$0xff]  ;;  %v356_v19 = vld [vmem:[#allocation9 + $0x190] sm:$0xff]  ;;  %v339_v20 = vld [vmem:[#allocation9 + $0x108] sm:$0xff] }
  0x42   :  { %375 = vmatpush.msrb.mxu0 %v316_v33  ;;  %395 = vmatpush.msrb.mxu1 %v332_v34  ;;  %v355_v21 = vld [vmem:[#allocation9 + $0x188] sm:$0xff]  ;;  %v338_v22 = vld [vmem:[#allocation9 + $0x100] sm:$0xff]  ;;  %v198_v24 = vld [vmem:[#allocation8] sm:$0xf] }
  0x43   :  { %415 = vmatpush.msrb.mxu2 %v348_v39  ;;  %435 = vmatpush.msrb.mxu3 %v364_v40  ;;  %v354_v23 = vld [vmem:[#allocation9 + $0x180] sm:$0xff]  ;;  %v200_v25 = vperm.slane %v198_v24, 0  ;;  %v201_v26 = vperm.slane %v198_v24, 1  ;;  %v202_v33 = vperm.slane %v198_v24, 2  ;;  %v203_v34 = vperm.slane %v198_v24, 3 }
  0x44   :  { %376 = vmatpush.msrb.mxu0 %v315_v37  ;;  %396 = vmatpush.msrb.mxu1 %v331_v38 }
  0x45   :  { %416 = vmatpush.msrb.mxu2 %v347_v44  ;;  %436 = vmatpush.msrb.mxu3 %v363_v45 }
  0x46   :  { %377 = vmatpush.msrb.mxu0 %v314_v42  ;;  %397 = vmatpush.msrb.mxu1 %v330_v43 }
  0x47   :  { %417 = vmatpush.msrb.mxu2 %v346_v49  ;;  %437 = vmatpush.msrb.mxu3 %v362_v50 }
  0x48   :  { %378 = vmatpush.msrb.mxu0 %v313_v46  ;;  %398 = vmatpush.msrb.mxu1 %v329_v47 }
  0x49   :  { %418 = vmatpush.msrb.mxu2 %v345_v56  ;;  %438 = vmatpush.msrb.mxu3 %v361_v57 }
  0x4a   :  { %379 = vmatpush.msrb.mxu0 %v312_v54  ;;  %399 = vmatpush.msrb.mxu1 %v328_v55 }
  0x4b   :  { %419 = vmatpush.msrb.mxu2 %v344_v62  ;;  %439 = vmatpush.msrb.mxu3 %v360_v63 }
  0x4c   :  { %380 = vmatpush.msrb.mxu0 %v311_v59  ;;  %400 = vmatpush.msrb.mxu1 %v327_v60 }
  0x4d   :  { %420 = vmatpush.msrb.mxu2 %v343_v8  ;;  %440 = vmatpush.msrb.mxu3 %v359_v9 }
  0x4e   :  { %381 = vmatpush.msrb.mxu0 %v310_v0  ;;  %401 = vmatpush.msrb.mxu1 %v326_v1 }
  0x4f   :  { %421 = vmatpush.msrb.mxu2 %v342_v12  ;;  %441 = vmatpush.msrb.mxu3 %v358_v13 }
  0x50   :  { %382 = vmatpush.msrb.mxu0 %v309_v2  ;;  %402 = vmatpush.msrb.mxu1 %v325_v3 }
  0x51   :  { %422 = vmatpush.msrb.mxu2 %v341_v16  ;;  %442 = vmatpush.msrb.mxu3 %v357_v17 }
  0x52   :  { %383 = vmatpush.msrb.mxu0 %v308_v6  ;;  %403 = vmatpush.msrb.mxu1 %v324_v7 }
  0x53   :  { %423 = vmatpush.msrb.mxu2 %v340_v18  ;;  %443 = vmatpush.msrb.mxu3 %v356_v19 }
  0x54   :  { %384 = vmatpush.msrb.mxu0 %v307_v10  ;;  %404 = vmatpush.msrb.mxu1 %v323_v11 }
  0x55   :  { %424 = vmatpush.msrb.mxu2 %v339_v20  ;;  %444 = vmatpush.msrb.mxu3 %v355_v21 }
  0x56   :  { %385 = vmatpush.msrb.mxu0 %v306_v14  ;;  %405 = vmatpush.msrb.mxu1 %v322_v15 }
  0x57   :  { %425 = vmatpush.msrb.mxu2 %v338_v22  ;;  %445 = vmatpush.msrb.mxu3 %v354_v23 }
  0x94   :  { %v111_v29 = vpop.xlane.xlu0 %110 }
  0x95   :  { %v121_v51 = vperm.slane %v111_v29, %v120_v41 }
  0x9c   :  { %v116_v48 = vpop.xlane.xlu0 %115 }
  0x9d   :  { %v122_v53 = vperm.slane %v116_v48, %v120_v41 }
  0x9f   :  { %v124_v58 = vsel %vm123_vm1, %v122_v53, %v121_v51 }
  0xa0   :  { %v126_v61 = vadd.f32 %v124_v58, %v92_v52  ;;  %v502_v52 = vld [vmem:[%s734_s4] ss:$0 sm:$0xff] }
  0xa2   :  { %128 = vst.msk [vmem:[#allocation2] sm:$0x3] %vm127_vm2, %v126_v61 }
  0xa9   :  { %v132_v4 = vld [vmem:[#allocation2] sm:$0xff] }
  0xaa   :  { %v133_v5 = vmul.f32 0.00390625, %v132_v4 }
  0xac   :  { %224 = vmatmul.f32.vlgmr.msra.gmra.mxu0 %v133_v5  ;;  %244 = vmatmul.f32.vlgmr.msra.gmra.mxu1 %v133_v5 }
  0xad   :  { %264 = vmatmul.f32.vlgmr.msra.gmra.mxu2 %v133_v5  ;;  %284 = vmatmul.f32.vlgmr.msra.gmra.mxu3 %v133_v5 }
 0x129   :  { %v225_v27 = vpop.f32.mrf.mxu0  ;;  %v245_v28 = vpop.f32.mrf.mxu1 }
 0x12a   :  { %v226_v29 = vadd.f32 %v225_v27, %v200_v25  ;;  %v246_v30 = vadd.f32 %v245_v28, %v201_v26 }
 0x12c   :  { %v288_v31 = vmax.f32 %v226_v29, 0.0  ;;  %v289_v32 = vmax.f32 %v246_v30, 0.0 }
 0x12e   :  { %386 = vmatmul.f32.vlgmr.msrb.gmra.mxu0 %v288_v31  ;;  %406 = vmatmul.f32.vlgmr.msrb.gmra.mxu1 %v289_v32  ;;  %v296_v39 = vrot.slane %v289_v32, 6 }
 0x130   :  { %v265_v35 = vpop.f32.mrf.mxu2  ;;  %v285_v36 = vpop.f32.mrf.mxu3  ;;  %v300_v44 = vsel %vm299_vm3, %v288_v31, %v296_v39 }
 0x131   :  { %v266_v37 = vadd.f32 %v265_v35, %v202_v33  ;;  %v286_v38 = vadd.f32 %v285_v36, %v203_v34 }
 0x133   :  { %v290_v40 = vmax.f32 %v266_v37, 0.0  ;;  %v291_v41 = vmax.f32 %v286_v38, 0.0 }
 0x135   :  { %v297_v42 = vrot.slane %v290_v40, 4  ;;  %v298_v43 = vrot.slane %v291_v41, 2  ;;  %426 = vmatmul.f32.vlgmr.msrb.gmra.mxu2 %v290_v40  ;;  %446 = vmatmul.f32.vlgmr.msrb.gmra.mxu3 %v291_v41 }
 0x137   :  { %v302_v45 = vsel %vm301_vm4, %v297_v42, %v298_v43 }
 0x138   :  { %v303_v46 = vsel %vm106_vm0, %v300_v44, %v302_v45 }
 0x139   :  { %305 = vst [vmem:[#allocation12] sm:$0xff] %v303_v46 }
 0x13a   :  { %477 = dma.vmem_to_hbm [thread:$0]  %s473_s3, 128, %s475_s21, [#allocation13]  }
 0x1ab   :  { %v387_v47 = vpop.f32.mrf.mxu0  ;;  %v407_v48 = vpop.f32.mrf.mxu1 }
 0x1ac   :  { %v408_v49 = vadd.f32 %v407_v48, %v387_v47 }
 0x1b8   :  { %v427_v50 = vpop.f32.mrf.mxu2  ;;  %v447_v53 = vpop.f32.mrf.mxu3 }
 0x1b9   :  { %v428_v51 = vadd.f32 %v427_v50, %v408_v49 }
 0x1bb   :  { %v448_v54 = vadd.f32 %v447_v53, %v428_v51 }
 0x1bd   :  { %v454_v55 = vadd.f32 %v502_v52, %v448_v54 }
 0x1bf   :  { %455 = vst [vmem:[#allocation11] sm:$0x3] %v454_v55 }
 0x1c0   :  { %466 = dma.vmem_to_hbm [thread:$0]  %s462_s25, 32, %s464_s28, [#allocation5]  }
 0x1c1   :  { %653 = dma.done.wait [#allocation5], 32  }
 0x1c2   :  { %654 = vsyncadd [#allocation5], 4294967264 }
 0x1c3   :  { %655 = dma.done.wait [#allocation13], 128  }
 0x1c4   :  { %656 = vsyncadd [#allocation13], 4294967168 }
 0x1c5   :  { %486 = vsyncpa [#allocation4], 1 }
 0x1c6   :  { %487 = vsyncpa [#allocation7], 1 }
 0x1c7   :  { %488 = vsyncpa [#allocation10], 1 }
 0x1c8   :  { %489 = vsyncpa [#allocation5], 1 }
 0x1c9   :  { %490 = vsyncpa [#allocation13], 1 }

</bundles_post_ra>
